<compile_context>
chip_gen: v7x
topology: tpu7x:2x2x1
jax: 0.10.0
libtpu: 0.0.40
codegen_flags: <defaults>
</compile_context>

<pallas_src>
import jax
import jax.numpy as jnp
from jax import lax
from jax.experimental import pallas as pl
from jax.experimental.pallas import tpu as pltpu

IN_DIM = 1024
HID1 = 512
HID2 = 256
OUT_DIM = 1          # output_channels=1 (module default)
BN_EPS = 1e-5


def _head_kernel(x_ref, w1_ref, b1_ref, w2_ref, b2_ref, w3_ref, b3_ref, out_ref):
    # x block: (Bt, 1024) bf16; weights/biases are whole-array VMEM-resident blocks.
    x = x_ref[...]                                                        # (Bt, 1024) bf16
    # Linear(1024,512,bias=False) + BN(512) folded -> bf16 matmul, f32 acc, f32 epilogue.
    h = jnp.dot(x, w1_ref[...], preferred_element_type=jnp.float32) + b1_ref[...]
    h = jnp.maximum(h, 0.0).astype(jnp.bfloat16)                          # (Bt, 512)
    # Dropout(p=0.3): identity in eval mode.
    # Linear(512,256,bias=False) + BN(256) folded; ReLU.
    h = jnp.dot(h, w2_ref[...], preferred_element_type=jnp.float32) + b2_ref[...]
    h = jnp.maximum(h, 0.0).astype(jnp.bfloat16)                          # (Bt, 256)
    # Dropout(p=0.3): identity in eval mode.
    # Final Linear(256, 1), computed transposed so the result is lane-dense (1, Bt):
    #   out_t[0, b] = sum_c w3[0, c] * h[b, c]   (+ bias)
    out_t = lax.dot_general(
        w3_ref[...], h,                                                   # (1,256), (Bt,256)
        dimension_numbers=(((1,), (1,)), ((), ())),
        preferred_element_type=jnp.float32,
    ) + b3_ref[...]                                                       # (1, Bt)
    out_ref[...] = out_t.astype(out_ref.dtype)


def _round_up(n, m):
    return ((n + m - 1) // m) * m


def _choose_b_tile(B):
    # Large batch: 512-row tiles (multiple of 256 -> fills v6e/v7x MXU rows,
    # amortizes the ~0.35 us per-grid-step overhead, >=2 grid steps).
    if B >= 1024:
        return 512
    # Medium batch: 256-row tiles keep >=2 grid steps (v7x megacore sharding).
    if B >= 512:
        return 256
    # Small batch: one full-array block (grid of 1); padded rows are dropped.
    return _round_up(B, 16)


def reg_head_pointnet(x, params):
    """x: (B, 1024) float32. params: [(W1,b1),(W2,b2),(W3,b3)] with W as (Cin,Cout) f32."""
    (w1, b1), (w2, b2), (w3, b3) = params
    B, d = x.shape
    assert d == IN_DIM

    b_tile = _choose_b_tile(B)
    b_pad = _round_up(B, b_tile)
    if b_pad != B:
        # Padded rows are computed and dropped; no batch reduction exists, so
        # padding cannot contaminate real outputs.
        x = jnp.pad(x, ((0, b_pad - B), (0, 0)))
    x = x.astype(jnp.bfloat16)

    # bf16 matmul operands (in practice pre-cast once, not per call).
    w1b = w1.astype(jnp.bfloat16)                          # (1024, 512)
    w2b = w2.astype(jnp.bfloat16)                          # (512, 256)
    w3b = w3.T.reshape(1, HID2).astype(jnp.bfloat16)       # (1, 256) row vector
    b1f = b1.reshape(1, HID1).astype(jnp.float32)
    b2f = b2.reshape(1, HID2).astype(jnp.float32)
    b3f = b3.reshape(1, OUT_DIM).astype(jnp.float32)       # (1, 1)

    in_specs = [
        pl.BlockSpec((b_tile, IN_DIM), lambda i: (i, 0)),   # x tile streams per grid step
        pl.BlockSpec((IN_DIM, HID1), lambda i: (0, 0)),     # weights: constant index ->
        pl.BlockSpec((1, HID1), lambda i: (0, 0)),          #   DMA'd once, VMEM-resident
        pl.BlockSpec((HID1, HID2), lambda i: (0, 0)),
        pl.BlockSpec((1, HID2), lambda i: (0, 0)),
        pl.BlockSpec((1, HID2), lambda i: (0, 0)),
        pl.BlockSpec((1, OUT_DIM), lambda i: (0, 0)),
    ]
    # Lane-dense output: (1, b_pad) with (1, b_tile) blocks indexed along lanes.
    out_spec = pl.BlockSpec((1, b_tile), lambda i: (0, i))

    out = pl.pallas_call(
        _head_kernel,
        out_shape=jax.ShapeDtypeStruct((1, b_pad), jnp.float32),
        grid_spec=pltpu.PrefetchScalarGridSpec(
            num_scalar_prefetch=0,
            grid=(b_pad // b_tile,),
            in_specs=in_specs,
            out_specs=out_spec,
        ),
        compiler_params=pltpu.CompilerParams(
            # Batch tiles are independent -> megacore-parallel on v7x.
            dimension_semantics=("parallel",),
            # Explicit, conservative limit; actual usage ~6 MiB at b_tile=512.
            vmem_limit_bytes=32 * 1024 * 1024,
        ),
    )(x, w1b, b1f, w2b, b2f, w3b, b3f)

    return out[0, :B].reshape(B, OUT_DIM)


def make_params(key):
    """Deterministic params with BatchNorm1d (eval running stats) folded into the
    preceding bias-free Linear. Returns [(W_eff (Cin,Cout) f32, b_eff (Cout,) f32), ...]."""
    params = []
    layers = [(IN_DIM, HID1, True), (HID1, HID2, True), (HID2, OUT_DIM, False)]
    for cin, cout, has_bn in layers:
        key, kw, kg, kb, km, kv, kbias = jax.random.split(key, 7)
        # torch nn.Linear weight layout is (Cout, Cin)
        w = jax.random.normal(kw, (cout, cin), jnp.float32) * 0.05
        if has_bn:
            gamma = 1.0 + 0.1 * jax.random.normal(kg, (cout,), jnp.float32)
            beta = 0.1 * jax.random.normal(kb, (cout,), jnp.float32)
            run_mean = 0.1 * jax.random.normal(km, (cout,), jnp.float32)
            run_var = jnp.abs(1.0 + 0.1 * jax.random.normal(kv, (cout,), jnp.float32))
            scale = gamma / jnp.sqrt(run_var + BN_EPS)
            w_eff = (w * scale[:, None]).T          # (Cin, Cout): x @ W.T then *scale
            b_eff = beta - run_mean * scale         # (Cout,)
        else:
            bias = 0.05 * jax.random.normal(kbias, (cout,), jnp.float32)
            w_eff = w.T                             # (Cin, Cout)
            b_eff = bias
        params.append((w_eff, b_eff))
    return params


def reference_forward(x, params):
    """Pure-JAX f32 reference with identical eval-mode semantics."""
    (w1, b1), (w2, b2), (w3, b3) = params
    h = jnp.maximum(x @ w1 + b1, 0.0)   # Linear+BN folded, ReLU; Dropout = identity
    h = jnp.maximum(h @ w2 + b2, 0.0)
    return h @ w3 + b3


if __name__ == "__main__":
    key = jax.random.PRNGKey(0)
    key, kx = jax.random.split(key)

    B = 2                                            # small example batch
    x = jax.random.normal(kx, (B, IN_DIM), jnp.float32)

    params = make_params(key)

    out = reg_head_pointnet(x, params)
    out = jax.block_until_ready(out)

    ref = reference_forward(x, params)
    assert out.shape == (B, OUT_DIM)
    # Kernel uses bf16 matmul operands with f32 accumulation -> slightly looser
    # tolerance than a pure-f32 comparison.
    assert jnp.allclose(out, ref, atol=2e-2, rtol=2e-2), "mismatch vs f32 reference"

    print("KERNEL_OK")
</pallas_src>

<mosaic_0001>
module attributes {stable_mosaic.version = 11 : i64} {
  func.func @_head_kernel(%arg0: i32, %arg1: memref<16x1024xbf16, #tpu.memory_space<vmem>>, %arg2: memref<1024x512xbf16, #tpu.memory_space<vmem>>, %arg3: memref<1x512xf32, #tpu.memory_space<vmem>>, %arg4: memref<512x256xbf16, #tpu.memory_space<vmem>>, %arg5: memref<1x256xf32, #tpu.memory_space<vmem>>, %arg6: memref<1x256xbf16, #tpu.memory_space<vmem>>, %arg7: memref<1x1xf32, #tpu.memory_space<vmem>>, %arg8: memref<1x16xf32, #tpu.memory_space<vmem>>) attributes {dimension_semantics = [#tpu.dimension_semantics<parallel>], iteration_bounds = array<i64: 1>, scalar_prefetch = 0 : i64, scratch_operands = 0 : i64, tpu.core_type = #tpu.core_type<tc>, window_params = [{transform_indices = @transform_0, window_bounds = array<i64: 16, 1024>}, {pipeline_mode = #tpu.pipeline_mode<synchronous>, transform_indices = @transform_1, window_bounds = array<i64: 1024, 512>}, {pipeline_mode = #tpu.pipeline_mode<synchronous>, transform_indices = @transform_2, window_bounds = array<i64: 1, 512>}, {pipeline_mode = #tpu.pipeline_mode<synchronous>, transform_indices = @transform_3, window_bounds = array<i64: 512, 256>}, {pipeline_mode = #tpu.pipeline_mode<synchronous>, transform_indices = @transform_4, window_bounds = array<i64: 1, 256>}, {pipeline_mode = #tpu.pipeline_mode<synchronous>, transform_indices = @transform_5, window_bounds = array<i64: 1, 256>}, {pipeline_mode = #tpu.pipeline_mode<synchronous>, transform_indices = @transform_6, window_bounds = array<i64: 1, 1>}, {transform_indices = @transform_7, window_bounds = array<i64: 1, 16>}]} {
    %c0 = arith.constant 0 : index
    %c0_0 = arith.constant 0 : index
    %0 = vector.load %arg1[%c0, %c0_0] : memref<16x1024xbf16, #tpu.memory_space<vmem>>, vector<16x1024xbf16>
    %c0_1 = arith.constant 0 : index
    %c0_2 = arith.constant 0 : index
    %1 = vector.load %arg2[%c0_1, %c0_2] : memref<1024x512xbf16, #tpu.memory_space<vmem>>, vector<1024x512xbf16>
    %cst = arith.constant dense<0.000000e+00> : vector<16x512xf32>
    %2 = tpu.matmul %0, %1, %cst {dimension_numbers = #tpu.dot_dimension_numbers<[1], [0], [0], [1], [0, 0, 1, 1], [], []>} : vector<16x1024xbf16>, vector<1024x512xbf16>, vector<16x512xf32> -> vector<16x512xf32>
    %c0_3 = arith.constant 0 : index
    %c0_4 = arith.constant 0 : index
    %3 = vector.load %arg3[%c0_3, %c0_4] : memref<1x512xf32, #tpu.memory_space<vmem>>, vector<1x512xf32>
    %4 = vector.broadcast %3 : vector<1x512xf32> to vector<16x512xf32>
    %5 = arith.addf %2, %4 : vector<16x512xf32>
    %cst_5 = arith.constant 0.000000e+00 : f32
    %6 = vector.broadcast %cst_5 : f32 to vector<16x512xf32>
    %7 = arith.maximumf %5, %6 : vector<16x512xf32>
    %8 = arith.truncf %7 : vector<16x512xf32> to vector<16x512xbf16>
    %c0_6 = arith.constant 0 : index
    %c0_7 = arith.constant 0 : index
    %9 = vector.load %arg4[%c0_6, %c0_7] : memref<512x256xbf16, #tpu.memory_space<vmem>>, vector<512x256xbf16>
    %cst_8 = arith.constant dense<0.000000e+00> : vector<16x256xf32>
    %10 = tpu.matmul %8, %9, %cst_8 {dimension_numbers = #tpu.dot_dimension_numbers<[1], [0], [0], [1], [0, 0, 1, 1], [], []>} : vector<16x512xbf16>, vector<512x256xbf16>, vector<16x256xf32> -> vector<16x256xf32>
    %c0_9 = arith.constant 0 : index
    %c0_10 = arith.constant 0 : index
    %11 = vector.load %arg5[%c0_9, %c0_10] : memref<1x256xf32, #tpu.memory_space<vmem>>, vector<1x256xf32>
    %12 = vector.broadcast %11 : vector<1x256xf32> to vector<16x256xf32>
    %13 = arith.addf %10, %12 : vector<16x256xf32>
    %cst_11 = arith.constant 0.000000e+00 : f32
    %14 = vector.broadcast %cst_11 : f32 to vector<16x256xf32>
    %15 = arith.maximumf %13, %14 : vector<16x256xf32>
    %16 = arith.truncf %15 : vector<16x256xf32> to vector<16x256xbf16>
    %c0_12 = arith.constant 0 : index
    %c0_13 = arith.constant 0 : index
    %17 = vector.load %arg6[%c0_12, %c0_13] : memref<1x256xbf16, #tpu.memory_space<vmem>>, vector<1x256xbf16>
    %cst_14 = arith.constant dense<0.000000e+00> : vector<1x16xf32>
    %18 = tpu.matmul %17, %16, %cst_14 {dimension_numbers = #tpu.dot_dimension_numbers<[1], [1], [0], [0], [0, 0, 1, 0], [], []>} : vector<1x256xbf16>, vector<16x256xbf16>, vector<1x16xf32> -> vector<1x16xf32>
    %c0_15 = arith.constant 0 : index
    %c0_16 = arith.constant 0 : index
    %19 = vector.load %arg7[%c0_15, %c0_16] : memref<1x1xf32, #tpu.memory_space<vmem>>, vector<1x1xf32>
    %20 = vector.broadcast %19 : vector<1x1xf32> to vector<1x16xf32>
    %21 = arith.addf %18, %20 : vector<1x16xf32>
    %c0_17 = arith.constant 0 : index
    %c0_18 = arith.constant 0 : index
    %22 = vector.load %arg8[%c0_17, %c0_18] : memref<1x16xf32, #tpu.memory_space<vmem>>, vector<1x16xf32>
    tpu.vector_store %arg8[%c0_17, %c0_18], %21 {strides = array<i32>} : memref<1x16xf32, #tpu.memory_space<vmem>>, vector<1x16xf32>,
    return
  }
  func.func @transform_0(%arg0: i32) -> (i32, i32) {
    %c0_i32 = arith.constant 0 : i32
    %c0_i32_0 = arith.constant 0 : i32
    return %arg0, %c0_i32 : i32, i32
  }
  func.func @transform_1(%arg0: i32) -> (i32, i32) {
    %c0_i32 = arith.constant 0 : i32
    %c0_i32_0 = arith.constant 0 : i32
    %c0_i32_1 = arith.constant 0 : i32
    return %c0_i32, %c0_i32_0 : i32, i32
  }
  func.func @transform_2(%arg0: i32) -> (i32, i32) {
    %c0_i32 = arith.constant 0 : i32
    %c0_i32_0 = arith.constant 0 : i32
    %c0_i32_1 = arith.constant 0 : i32
    return %c0_i32, %c0_i32_0 : i32, i32
  }
  func.func @transform_3(%arg0: i32) -> (i32, i32) {
    %c0_i32 = arith.constant 0 : i32
    %c0_i32_0 = arith.constant 0 : i32
    %c0_i32_1 = arith.constant 0 : i32
    return %c0_i32, %c0_i32_0 : i32, i32
  }
  func.func @transform_4(%arg0: i32) -> (i32, i32) {
    %c0_i32 = arith.constant 0 : i32
    %c0_i32_0 = arith.constant 0 : i32
    %c0_i32_1 = arith.constant 0 : i32
    return %c0_i32, %c0_i32_0 : i32, i32
  }
  func.func @transform_5(%arg0: i32) -> (i32, i32) {
    %c0_i32 = arith.constant 0 : i32
    %c0_i32_0 = arith.constant 0 : i32
    %c0_i32_1 = arith.constant 0 : i32
    return %c0_i32, %c0_i32_0 : i32, i32
  }
  func.func @transform_6(%arg0: i32) -> (i32, i32) {
    %c0_i32 = arith.constant 0 : i32
    %c0_i32_0 = arith.constant 0 : i32
    %c0_i32_1 = arith.constant 0 : i32
    return %c0_i32, %c0_i32_0 : i32, i32
  }
  func.func @transform_7(%arg0: i32) -> (i32, i32) {
    %c0_i32 = arith.constant 0 : i32
    %c0_i32_0 = arith.constant 0 : i32
    return %c0_i32, %arg0 : i32, i32
  }
}

</mosaic_0001>

<bundles_post_ra>
// kernel: tpu_custom_call.1
= control target key start
LH: loop header
LB: loop body
LE: loop exit
PB: predicated region body
PF: predicated region fallthrough
CT: control target
= control target key end

     0   :  { %s3749_s0 = inlined_call_operand.hbm [shape: bf16[16,1024], index: 0, kind: input, shape index: {}]   ;;  %s3750_s1 = inlined_call_operand.hbm [shape: bf16[1024,512], index: 1, kind: input, shape index: {}]   ;;  %s3751_s2 = inlined_call_operand.vmem [shape: f32[1,512], index: 2, kind: input, shape index: {}]   ;;  %s3752_s3 = inlined_call_operand.hbm [shape: bf16[512,256], index: 3, kind: input, shape index: {}]   ;;  %s3753_s4 = inlined_call_operand.vmem [shape: f32[1,256], index: 4, kind: input, shape index: {}]   ;;  %s3754_s5 = inlined_call_operand.vmem [shape: bf16[1,256], index: 5, kind: input, shape index: {}]   ;;  %s3755_s6 = inlined_call_operand.<no memory space> [shape: f32[1,1], index: 6, kind: input, shape index: {}]   ;;  %s3756_s7 = inlined_call_operand.hbm [shape: f32[1,16], index: 7, kind: output, shape index: {}]  }
   0x1   :  { %v12_v0 = vstv %s3755_s6 }
   0x2   :  { %13 = vst [vmem:[#allocation2] sm:$0x1] %v12_v0 }
   0x3   :  { %14 = vsyncpa [#allocation4], 0 }
   0x4   :  { %15 = vsyncpa [#allocation7], 0 }
   0x5   :  { %16 = vsyncpa [#allocation5], 0  ;;  %s3571_s26 = smov [#allocation6]   ;;  %s3477_s30 = scalar_lea.hbm %s3750_s1, 32768 }
   0x6   :  { %s34_s27 = sshll.u32 %s3571_s26, 4  ;;  %p3478_p0 = scmp.ne.s32.totalorder %s3750_s1, %s3477_s30  ;;  %s35_s27 = int_to_ptr.vmem [resolvable:$true] %s34_s27 }
   0x7   :  { %p3481_p1 = scmp.lt.u32.totalorder %s3477_s30, %s3750_s1 }
   0x9   :  { %p3483_p2 = pnand %p3481_p1, %p3478_p0 }
   0xb   :  { %3486 = shalt.err (!%p3483_p2)
}
   0xc   :  { %s3487_s6 = scalar_lea.vmem %s35_s27, 32768  ;;  %p3492_p4 = scmp.lt.s32.totalorder %s35_s27, %s35_s27 }
   0xd   :  { %p3488_p3 = scmp.ne.s32.totalorder %s35_s27, %s3487_s6  ;;  %p3493_p5 = scmp.lt.s32.totalorder %s3487_s6, %s3487_s6 }
   0xf   :  { %p3494_p6 = por %p3493_p5, %p3492_p4 }
  0x11   :  { %p3495_p7 = pnand %p3494_p6, %p3488_p3 }
  0x13   :  { %3498 = shalt.err (!%p3495_p7)
}
  0x14   :  { %s3572_s12 = smov 256   ;;  %s3573_s13 = smov 16  }
  0x15   :  { %40 = dma.hbm_to_vmem [thread:$0]  %s3750_s1, 32768, %s35_s27, [#allocation7], %s3572_s12, %s3572_s12, %s3573_s13  }
  0x16   :  { %s3574_s16 = smov [#allocation3]   ;;  %s3499_s20 = scalar_lea.hbm %s3749_s0, 1024 }
  0x17   :  { %s22_s17 = sshll.u32 %s3574_s16, 4  ;;  %p3500_p8 = scmp.ne.s32.totalorder %s3749_s0, %s3499_s20  ;;  %s23_s17 = int_to_ptr.vmem [resolvable:$true] %s22_s17 }
  0x18   :  { %p3503_p9 = scmp.lt.u32.totalorder %s3499_s20, %s3749_s0 }
  0x1a   :  { %p3505_p10 = pnand %p3503_p9, %p3500_p8 }
  0x1c   :  { %3508 = shalt.err (!%p3505_p10)
}
  0x1d   :  { %s3509_s25 = scalar_lea.vmem %s23_s17, 1024  ;;  %p3514_p12 = scmp.lt.s32.totalorder %s23_s17, %s23_s17 }
  0x1e   :  { %p3510_p11 = scmp.ne.s32.totalorder %s23_s17, %s3509_s25  ;;  %p3515_p13 = scmp.lt.s32.totalorder %s3509_s25, %s3509_s25 }
  0x20   :  { %p3516_p0 = por %p3515_p13, %p3514_p12 }
  0x22   :  { %p3517_p1 = pnand %p3516_p0, %p3510_p11 }
  0x24   :  { %3520 = shalt.err (!%p3517_p1)
}
  0x25   :  { %s3575_s1 = smov 512   ;;  %s3576_s26 = smov 32  }
  0x26   :  { %28 = dma.hbm_to_vmem [thread:$0]  %s3749_s0, 1024, %s23_s17, [#allocation4], %s3575_s1, %s3575_s1, %s3576_s26  }
  0x27   :  { %s3577_s29 = smov [#allocation8]   ;;  %s3521_s10 = scalar_lea.hbm %s3752_s3, 8192 }
  0x28   :  { %s48_s30 = sshll.u32 %s3577_s29, 4  ;;  %p3522_p2 = scmp.ne.s32.totalorder %s3752_s3, %s3521_s10  ;;  %s49_s30 = int_to_ptr.vmem [resolvable:$true] %s48_s30 }
  0x29   :  { %p3525_p3 = scmp.lt.u32.totalorder %s3521_s10, %s3752_s3 }
  0x2b   :  { %p3527_p4 = pnand %p3525_p3, %p3522_p2 }
  0x2d   :  { %3530 = shalt.err (!%p3527_p4)
}
  0x2e   :  { %s3531_s14 = scalar_lea.vmem %s49_s30, 8192  ;;  %p3536_p6 = scmp.lt.s32.totalorder %s49_s30, %s49_s30 }
  0x2f   :  { %p3532_p5 = scmp.ne.s32.totalorder %s49_s30, %s3531_s14  ;;  %p3537_p7 = scmp.lt.s32.totalorder %s3531_s14, %s3531_s14 }
  0x31   :  { %p3538_p8 = por %p3537_p7, %p3536_p6 }
  0x33   :  { %p3539_p9 = pnand %p3538_p8, %p3532_p5 }
  0x35   :  { %3542 = shalt.err (!%p3539_p9)
}
  0x36   :  { %s3578_s0 = smov 128   ;;  %s3579_s15 = smov 8  }
  0x37   :  { %54 = dma.hbm_to_vmem [thread:$0]  %s3752_s3, 8192, %s49_s30, [#allocation7], %s3578_s0, %s3578_s0, %s3579_s15  }
  0x38   :  { %3565 = dma.done.wait [#allocation4], 1024  }
  0x39   :  { %3566 = vsyncadd [#allocation4], 4294966272 }
  0x3a   :  { %3567 = dma.done.wait [#allocation7], 40960  }
  0x3b   :  { %3568 = vsyncadd [#allocation7], 4294926336  ;;  %v2997_v1 = vld [vmem:[#allocation6 + $0x4] ss:$16 sps:$4 sm:$0xff]   ;;  %v3001_v3 = vld [vmem:[#allocation6] ss:$16 sps:$4 sm:$0xff]  }
  0x3c   :  { %v2999_v2 = vld [vmem:[#allocation6 + $0x204] ss:$16 sps:$4 sm:$0xff]   ;;  %1677 = vmatprep.subr.bf16.mxu1 %v2997_v1  ;;  %v3002_v4 = vld [vmem:[#allocation6 + $0x200] ss:$16 sps:$4 sm:$0xff]   ;;  %v72_v51 = vld [vmem:[#allocation3 + $0x8] sm:$0xff]  ;;  %vm2597_vm0 = vcmask 122880  }
  0x3d   :  { %1720 = vmatprep.subr.bf16.mxu0 %v2999_v2  ;;  %v3003_v5 = vld [vmem:[#allocation6 + $0x24] ss:$16 sps:$4 sm:$0xff]   ;;  %1678 = vmatpush1.bf16.msra.mxu1 %v3001_v3  ;;  %v3007_v7 = vld [vmem:[#allocation6 + $0x20] ss:$16 sps:$4 sm:$0xff]   ;;  %v76_v52 = vld [vmem:[#allocation3 + $0x28] sm:$0xff] }
  0x3e   :  { %1721 = vmatpush1.bf16.msra.mxu0 %v3002_v4  ;;  %v3005_v6 = vld [vmem:[#allocation6 + $0x224] ss:$16 sps:$4 sm:$0xff]   ;;  %1679 = vmatprep.subr.bf16.mxu1 %v3003_v5  ;;  %v3008_v8 = vld [vmem:[#allocation6 + $0x220] ss:$16 sps:$4 sm:$0xff]   ;;  %v3662_v56 = vcombine.high %v72_v51, %v76_v52 }
  0x3f   :  { %1722 = vmatprep.subr.bf16.mxu0 %v3005_v6  ;;  %v3009_v9 = vld [vmem:[#allocation6 + $0x44] ss:$16 sps:$4 sm:$0xff]   ;;  %v3013_v11 = vld [vmem:[#allocation6 + $0x40] ss:$16 sps:$4 sm:$0xff]  }
  0x40   :  { %v3011_v10 = vld [vmem:[#allocation6 + $0x244] ss:$16 sps:$4 sm:$0xff]   ;;  %v3014_v12 = vld [vmem:[#allocation6 + $0x240] ss:$16 sps:$4 sm:$0xff]   ;;  %1752 = vmatprep.mubr.bf16.mxu0 %v3662_v56 }
  0x41   :  { %1680 = vmatpush1.bf16.msra.mxu1 %v3007_v7  ;;  %v3015_v13 = vld [vmem:[#allocation6 + $0x64] ss:$16 sps:$4 sm:$0xff]   ;;  %v3019_v15 = vld [vmem:[#allocation6 + $0x60] ss:$16 sps:$4 sm:$0xff]  }
  0x42   :  { %1723 = vmatpush1.bf16.msra.mxu0 %v3008_v8  ;;  %1681 = vmatprep.subr.bf16.mxu1 %v3009_v9  ;;  %v3017_v14 = vld [vmem:[#allocation6 + $0x264] ss:$16 sps:$4 sm:$0xff]   ;;  %v3020_v16 = vld [vmem:[#allocation6 + $0x260] ss:$16 sps:$4 sm:$0xff]   ;;  %v3098_v8 = vld [vmem:[#allocation6 + $0xc] ss:$16 sps:$4 sm:$0xff]  }
  0x43   :  { %1724 = vmatprep.subr.bf16.mxu0 %v3011_v10  ;;  %v3021_v17 = vld [vmem:[#allocation6 + $0x84] ss:$16 sps:$4 sm:$0xff]   ;;  %v3025_v19 = vld [vmem:[#allocation6 + $0x80] ss:$16 sps:$4 sm:$0xff]   ;;  %v3667_v10 = vcombine.low %v72_v51, %v76_v52  ;;  %v3150_v51 = vld [vmem:[#allocation6 + $0x128] ss:$16 sps:$4 sm:$0xff]  }
  0x44   :  { %v3023_v18 = vld [vmem:[#allocation6 + $0x284] ss:$16 sps:$4 sm:$0xff]   ;;  %v3026_v20 = vld [vmem:[#allocation6 + $0x280] ss:$16 sps:$4 sm:$0xff]  }
  0x45   :  { %1682 = vmatpush1.bf16.msra.mxu1 %v3013_v11  ;;  %v3027_v21 = vld [vmem:[#allocation6 + $0xa4] ss:$16 sps:$4 sm:$0xff]   ;;  %v3031_v23 = vld [vmem:[#allocation6 + $0xa0] ss:$16 sps:$4 sm:$0xff]  }
  0x46   :  { %1725 = vmatpush1.bf16.msra.mxu0 %v3014_v12  ;;  %1683 = vmatprep.subr.bf16.mxu1 %v3015_v13  ;;  %v3029_v22 = vld [vmem:[#allocation6 + $0x2a4] ss:$16 sps:$4 sm:$0xff]   ;;  %v3032_v24 = vld [vmem:[#allocation6 + $0x2a0] ss:$16 sps:$4 sm:$0xff]   ;;  %v3096_v12 = vld [vmem:[#allocation6 + $0x8] ss:$16 sps:$4 sm:$0xff]  }
  0x47   :  { %1726 = vmatprep.subr.bf16.mxu0 %v3017_v14  ;;  %v3033_v25 = vld [vmem:[#allocation6 + $0xc4] ss:$16 sps:$4 sm:$0xff]   ;;  %v3037_v27 = vld [vmem:[#allocation6 + $0xc0] ss:$16 sps:$4 sm:$0xff]   ;;  %v3104_v14 = vld [vmem:[#allocation6 + $0x2c] ss:$16 sps:$4 sm:$0xff]  }
  0x48   :  { %v3035_v26 = vld [vmem:[#allocation6 + $0x2c4] ss:$16 sps:$4 sm:$0xff]   ;;  %v3038_v28 = vld [vmem:[#allocation6 + $0x2c0] ss:$16 sps:$4 sm:$0xff]  }
  0x49   :  { %1684 = vmatpush1.bf16.msra.mxu1 %v3019_v15  ;;  %v3039_v29 = vld [vmem:[#allocation6 + $0xe4] ss:$16 sps:$4 sm:$0xff]   ;;  %v3043_v31 = vld [vmem:[#allocation6 + $0xe0] ss:$16 sps:$4 sm:$0xff]  }
  0x4a   :  { %1727 = vmatpush1.bf16.msra.mxu0 %v3020_v16  ;;  %1685 = vmatprep.subr.bf16.mxu1 %v3021_v17  ;;  %v3041_v30 = vld [vmem:[#allocation6 + $0x2e4] ss:$16 sps:$4 sm:$0xff]   ;;  %v3044_v32 = vld [vmem:[#allocation6 + $0x2e0] ss:$16 sps:$4 sm:$0xff]   ;;  %v3102_v16 = vld [vmem:[#allocation6 + $0x28] ss:$16 sps:$4 sm:$0xff]  }
  0x4b   :  { %1728 = vmatprep.subr.bf16.mxu0 %v3023_v18  ;;  %v3045_v33 = vld [vmem:[#allocation6 + $0x104] ss:$16 sps:$4 sm:$0xff]   ;;  %v3049_v35 = vld [vmem:[#allocation6 + $0x100] ss:$16 sps:$4 sm:$0xff]   ;;  %v3110_v18 = vld [vmem:[#allocation6 + $0x4c] ss:$16 sps:$4 sm:$0xff]  }
  0x4c   :  { %v3047_v34 = vld [vmem:[#allocation6 + $0x304] ss:$16 sps:$4 sm:$0xff]   ;;  %v3050_v36 = vld [vmem:[#allocation6 + $0x300] ss:$16 sps:$4 sm:$0xff]  }
  0x4d   :  { %1686 = vmatpush1.bf16.msra.mxu1 %v3025_v19  ;;  %v3051_v37 = vld [vmem:[#allocation6 + $0x124] ss:$16 sps:$4 sm:$0xff]   ;;  %v3055_v39 = vld [vmem:[#allocation6 + $0x120] ss:$16 sps:$4 sm:$0xff]  }
  0x4e   :  { %1729 = vmatpush1.bf16.msra.mxu0 %v3026_v20  ;;  %1687 = vmatprep.subr.bf16.mxu1 %v3027_v21  ;;  %v3053_v38 = vld [vmem:[#allocation6 + $0x324] ss:$16 sps:$4 sm:$0xff]   ;;  %v3056_v40 = vld [vmem:[#allocation6 + $0x320] ss:$16 sps:$4 sm:$0xff]   ;;  %v3108_v20 = vld [vmem:[#allocation6 + $0x48] ss:$16 sps:$4 sm:$0xff]  }
  0x4f   :  { %1730 = vmatprep.subr.bf16.mxu0 %v3029_v22  ;;  %v3057_v41 = vld [vmem:[#allocation6 + $0x144] ss:$16 sps:$4 sm:$0xff]   ;;  %v3061_v43 = vld [vmem:[#allocation6 + $0x140] ss:$16 sps:$4 sm:$0xff]   ;;  %v3116_v22 = vld [vmem:[#allocation6 + $0x6c] ss:$16 sps:$4 sm:$0xff]  }
  0x50   :  { %v3059_v42 = vld [vmem:[#allocation6 + $0x344] ss:$16 sps:$4 sm:$0xff]   ;;  %v3062_v44 = vld [vmem:[#allocation6 + $0x340] ss:$16 sps:$4 sm:$0xff]  }
  0x51   :  { %1688 = vmatpush1.bf16.msra.mxu1 %v3031_v23  ;;  %v3063_v45 = vld [vmem:[#allocation6 + $0x164] ss:$16 sps:$4 sm:$0xff]   ;;  %v3067_v47 = vld [vmem:[#allocation6 + $0x160] ss:$16 sps:$4 sm:$0xff]  }
  0x52   :  { %1731 = vmatpush1.bf16.msra.mxu0 %v3032_v24  ;;  %1689 = vmatprep.subr.bf16.mxu1 %v3033_v25  ;;  %v3065_v46 = vld [vmem:[#allocation6 + $0x364] ss:$16 sps:$4 sm:$0xff]   ;;  %v3068_v48 = vld [vmem:[#allocation6 + $0x360] ss:$16 sps:$4 sm:$0xff]   ;;  %v3114_v24 = vld [vmem:[#allocation6 + $0x68] ss:$16 sps:$4 sm:$0xff]  }
  0x53   :  { %1732 = vmatprep.subr.bf16.mxu0 %v3035_v26  ;;  %v71_v49 = vld [vmem:[#allocation3] sm:$0xff]  ;;  %v3122_v26 = vld [vmem:[#allocation6 + $0x8c] ss:$16 sps:$4 sm:$0xff]  }
  0x54   :  { %v75_v50 = vld [vmem:[#allocation3 + $0x20] sm:$0xff] }
  0x55   :  { %1690 = vmatpush1.bf16.msra.mxu1 %v3037_v27  ;;  %v3069_v53 = vld [vmem:[#allocation6 + $0x184] ss:$16 sps:$4 sm:$0xff]   ;;  %v2616_v54 = vcombine.high %v71_v49, %v75_v50  ;;  %v3073_v57 = vld [vmem:[#allocation6 + $0x180] ss:$16 sps:$4 sm:$0xff]   ;;  %v3665_v9 = vcombine.low %v71_v49, %v75_v50  ;;  %v3152_v49 = vld [vmem:[#allocation6 + $0x12c] ss:$16 sps:$4 sm:$0xff]  }
  0x56   :  { %1733 = vmatpush1.bf16.msra.mxu0 %v3038_v28  ;;  %1691 = vmatprep.subr.bf16.mxu1 %v3039_v29  ;;  %v3071_v55 = vld [vmem:[#allocation6 + $0x384] ss:$16 sps:$4 sm:$0xff]   ;;  %v3074_v58 = vld [vmem:[#allocation6 + $0x380] ss:$16 sps:$4 sm:$0xff]   ;;  %v3120_v28 = vld [vmem:[#allocation6 + $0x88] ss:$16 sps:$4 sm:$0xff]  }
  0x57   :  { %1734 = vmatprep.subr.bf16.mxu0 %v3041_v30  ;;  %1709 = vmatprep.mubr.bf16.mxu1 %v2616_v54  ;;  %v3075_v59 = vld [vmem:[#allocation6 + $0x1a4] ss:$16 sps:$4 sm:$0xff]   ;;  %v3079_v61 = vld [vmem:[#allocation6 + $0x1a0] ss:$16 sps:$4 sm:$0xff]   ;;  %v3128_v30 = vld [vmem:[#allocation6 + $0xac] ss:$16 sps:$4 sm:$0xff]  }
  0x58   :  { %v3077_v60 = vld [vmem:[#allocation6 + $0x3a4] ss:$16 sps:$4 sm:$0xff]   ;;  %v3080_v62 = vld [vmem:[#allocation6 + $0x3a0] ss:$16 sps:$4 sm:$0xff]  }
  0x59   :  { %1692 = vmatpush1.bf16.msra.mxu1 %v3043_v31  ;;  %v3081_v63 = vld [vmem:[#allocation6 + $0x1c4] ss:$16 sps:$4 sm:$0xff]   ;;  %v3085_v1 = vld [vmem:[#allocation6 + $0x1c0] ss:$16 sps:$4 sm:$0xff]  }
  0x5a   :  { %1735 = vmatpush1.bf16.msra.mxu0 %v3044_v32  ;;  %1693 = vmatprep.subr.bf16.mxu1 %v3045_v33  ;;  %v3083_v0 = vld [vmem:[#allocation6 + $0x3c4] ss:$16 sps:$4 sm:$0xff]   ;;  %v3086_v2 = vld [vmem:[#allocation6 + $0x3c0] ss:$16 sps:$4 sm:$0xff]   ;;  %v3126_v32 = vld [vmem:[#allocation6 + $0xa8] ss:$16 sps:$4 sm:$0xff]  }
  0x5b   :  { %1736 = vmatprep.subr.bf16.mxu0 %v3047_v34  ;;  %v3087_v3 = vld [vmem:[#allocation6 + $0x1e4] ss:$16 sps:$4 sm:$0xff]   ;;  %v3091_v5 = vld [vmem:[#allocation6 + $0x1e0] ss:$16 sps:$4 sm:$0xff]   ;;  %v3134_v34 = vld [vmem:[#allocation6 + $0xcc] ss:$16 sps:$4 sm:$0xff]  }
  0x5c   :  { %v3089_v4 = vld [vmem:[#allocation6 + $0x3e4] ss:$16 sps:$4 sm:$0xff]   ;;  %v3092_v6 = vld [vmem:[#allocation6 + $0x3e0] ss:$16 sps:$4 sm:$0xff]  }
  0x5d   :  { %1694 = vmatpush1.bf16.msra.mxu1 %v3049_v35  ;;  %v3095_v7 = vld [vmem:[#allocation6 + $0x404] ss:$16 sps:$4 sm:$0xff]   ;;  %v3093_v11 = vld [vmem:[#allocation6 + $0x400] ss:$16 sps:$4 sm:$0xff]  }
  0x5e   :  { %1737 = vmatpush1.bf16.msra.mxu0 %v3050_v36  ;;  %1695 = vmatprep.subr.bf16.mxu1 %v3051_v37  ;;  %v3101_v13 = vld [vmem:[#allocation6 + $0x424] ss:$16 sps:$4 sm:$0xff]   ;;  %v3099_v15 = vld [vmem:[#allocation6 + $0x420] ss:$16 sps:$4 sm:$0xff]  }
  0x5f   :  { %1738 = vmatprep.subr.bf16.mxu0 %v3053_v38  ;;  %v3107_v17 = vld [vmem:[#allocation6 + $0x444] ss:$16 sps:$4 sm:$0xff]   ;;  %v3105_v19 = vld [vmem:[#allocation6 + $0x440] ss:$16 sps:$4 sm:$0xff]   ;;  %v3132_v38 = vld [vmem:[#allocation6 + $0xc8] ss:$16 sps:$4 sm:$0xff]  }
  0x60   :  { %v3113_v21 = vld [vmem:[#allocation6 + $0x464] ss:$16 sps:$4 sm:$0xff]   ;;  %v3111_v23 = vld [vmem:[#allocation6 + $0x460] ss:$16 sps:$4 sm:$0xff]  }
  0x61   :  { %1696 = vmatpush1.bf16.msra.mxu1 %v3055_v39  ;;  %v3119_v25 = vld [vmem:[#allocation6 + $0x484] ss:$16 sps:$4 sm:$0xff]   ;;  %v3117_v27 = vld [vmem:[#allocation6 + $0x480] ss:$16 sps:$4 sm:$0xff]  }
  0x62   :  { %1739 = vmatpush1.bf16.msra.mxu0 %v3056_v40  ;;  %1697 = vmatprep.subr.bf16.mxu1 %v3057_v41  ;;  %v3125_v29 = vld [vmem:[#allocation6 + $0x4a4] ss:$16 sps:$4 sm:$0xff]   ;;  %v3123_v31 = vld [vmem:[#allocation6 + $0x4a0] ss:$16 sps:$4 sm:$0xff]   ;;  %v3140_v41 = vld [vmem:[#allocation6 + $0xec] ss:$16 sps:$4 sm:$0xff]  }
  0x63   :  { %1740 = vmatprep.subr.bf16.mxu0 %v3059_v42  ;;  %v3131_v33 = vld [vmem:[#allocation6 + $0x4c4] ss:$16 sps:$4 sm:$0xff]   ;;  %v3129_v37 = vld [vmem:[#allocation6 + $0x4c0] ss:$16 sps:$4 sm:$0xff]  }
  0x64   :  { %v3671_v35 = vld [vmem:[#allocation3 + $0x10] sm:$0xff] }
  0x65   :  { %1698 = vmatpush1.bf16.msra.mxu1 %v3061_v43  ;;  %v3673_v36 = vld [vmem:[#allocation3 + $0x30] sm:$0xff]  ;;  %v3138_v43 = vld [vmem:[#allocation6 + $0xe8] ss:$16 sps:$4 sm:$0xff]  }
  0x66   :  { %1741 = vmatpush1.bf16.msra.mxu0 %v3062_v44  ;;  %1699 = vmatprep.subr.bf16.mxu1 %v3063_v45  ;;  %v3677_v39 = vcombine.high %v3671_v35, %v3673_v36  ;;  %v3137_v40 = vld [vmem:[#allocation6 + $0x4e4] ss:$16 sps:$4 sm:$0xff]   ;;  %v3135_v42 = vld [vmem:[#allocation6 + $0x4e0] ss:$16 sps:$4 sm:$0xff]   ;;  %v3146_v45 = vld [vmem:[#allocation6 + $0x10c] ss:$16 sps:$4 sm:$0xff]  }
  0x67   :  { %1742 = vmatprep.subr.bf16.mxu0 %v3065_v46  ;;  %v3143_v44 = vld [vmem:[#allocation6 + $0x504] ss:$16 sps:$4 sm:$0xff]   ;;  %v3141_v46 = vld [vmem:[#allocation6 + $0x500] ss:$16 sps:$4 sm:$0xff]  }
  0x68   :  { %v3147_v50 = vld [vmem:[#allocation6 + $0x520] ss:$16 sps:$4 sm:$0xff]   ;;  %v3155_v52 = vld [vmem:[#allocation6 + $0x544] ss:$16 sps:$4 sm:$0xff]  }
  0x69   :  { %1700 = vmatpush1.bf16.msra.mxu1 %v3067_v47  ;;  %v3144_v47 = vld [vmem:[#allocation6 + $0x108] ss:$16 sps:$4 sm:$0xff]  }
  0x6a   :  { %1743 = vmatpush1.bf16.msra.mxu0 %v3068_v48  ;;  %1701 = vmatprep.subr.bf16.mxu1 %v3069_v53  ;;  %v3149_v48 = vld [vmem:[#allocation6 + $0x524] ss:$16 sps:$4 sm:$0xff]   ;;  %v3158_v53 = vld [vmem:[#allocation6 + $0x14c] ss:$16 sps:$4 sm:$0xff]  }
  0x6b   :  { %1744 = vmatprep.subr.bf16.mxu0 %v3071_v55  ;;  %v3156_v55 = vld [vmem:[#allocation6 + $0x148] ss:$16 sps:$4 sm:$0xff]  }
  0x6d   :  { %1702 = vmatpush1.bf16.msra.mxu1 %v3073_v57  ;;  %v3161_v57 = vld [vmem:[#allocation6 + $0x564] ss:$16 sps:$4 sm:$0xff]  }
  0x6e   :  { %1745 = vmatpush1.bf16.msra.mxu0 %v3074_v58  ;;  %1703 = vmatprep.subr.bf16.mxu1 %v3075_v59  ;;  %v3164_v58 = vld [vmem:[#allocation6 + $0x16c] ss:$16 sps:$4 sm:$0xff]   ;;  %v3159_v59 = vld [vmem:[#allocation6 + $0x560] ss:$16 sps:$4 sm:$0xff]  }
  0x6f   :  { %1746 = vmatprep.subr.bf16.mxu0 %v3077_v60  ;;  %v3162_v60 = vld [vmem:[#allocation6 + $0x168] ss:$16 sps:$4 sm:$0xff]  }
  0x71   :  { %1704 = vmatpush1.bf16.msra.mxu1 %v3079_v61  ;;  %v3167_v61 = vld [vmem:[#allocation6 + $0x584] ss:$16 sps:$4 sm:$0xff]  }
  0x72   :  { %1747 = vmatpush1.bf16.msra.mxu0 %v3080_v62  ;;  %1705 = vmatprep.subr.bf16.mxu1 %v3081_v63  ;;  %v3170_v62 = vld [vmem:[#allocation6 + $0x18c] ss:$16 sps:$4 sm:$0xff]   ;;  %v3165_v63 = vld [vmem:[#allocation6 + $0x580] ss:$16 sps:$4 sm:$0xff]  }
  0x73   :  { %1748 = vmatprep.subr.bf16.mxu0 %v3083_v0  ;;  %v3168_v0 = vld [vmem:[#allocation6 + $0x188] ss:$16 sps:$4 sm:$0xff]  }
  0x75   :  { %1706 = vmatpush1.bf16.msra.mxu1 %v3085_v1  ;;  %v3173_v1 = vld [vmem:[#allocation6 + $0x5a4] ss:$16 sps:$4 sm:$0xff]  }
  0x76   :  { %1749 = vmatpush1.bf16.msra.mxu0 %v3086_v2  ;;  %1707 = vmatprep.subr.bf16.mxu1 %v3087_v3  ;;  %v3176_v2 = vld [vmem:[#allocation6 + $0x1ac] ss:$16 sps:$4 sm:$0xff]   ;;  %v3171_v3 = vld [vmem:[#allocation6 + $0x5a0] ss:$16 sps:$4 sm:$0xff]  }
  0x77   :  { %1750 = vmatprep.subr.bf16.mxu0 %v3089_v4  ;;  %v3174_v4 = vld [vmem:[#allocation6 + $0x1a8] ss:$16 sps:$4 sm:$0xff]  }
  0x79   :  { %1708 = vmatpush1.bf16.msra.mxu1 %v3091_v5  ;;  %v3179_v5 = vld [vmem:[#allocation6 + $0x5c4] ss:$16 sps:$4 sm:$0xff]  }
  0x7a   :  { %1751 = vmatpush1.bf16.msra.mxu0 %v3092_v6  ;;  %1849 = vmatprep.subr.bf16.mxu1 %v3098_v8  ;;  %v3182_v6 = vld [vmem:[#allocation6 + $0x1cc] ss:$16 sps:$4 sm:$0xff]   ;;  %v3180_v8 = vld [vmem:[#allocation6 + $0x1c8] ss:$16 sps:$4 sm:$0xff]  }
  0x7b   :  { %1763 = vmatprep.subr.bf16.mxu0 %v3095_v7  ;;  %v3177_v7 = vld [vmem:[#allocation6 + $0x5c0] ss:$16 sps:$4 sm:$0xff]  }
  0x7c   :  { %1710 = vmatmul.mubr.bf16.vlgmr.msra.gmra.mrb[0].mxu1 %v3665_v9 }
  0x7d   :  { %1753 = vmatmul.mubr.bf16.vlgmr.msra.gmra.mrb[0].mxu0 %v3667_v10  ;;  %1850 = vmatpush1.bf16.msra.mxu1 %v3096_v12  ;;  %v3188_v12 = vld [vmem:[#allocation6 + $0x1ec] ss:$16 sps:$4 sm:$0xff]  }
  0x7e   :  { %1764 = vmatpush1.bf16.msra.mxu0 %v3093_v11  ;;  %1851 = vmatprep.subr.bf16.mxu1 %v3104_v14  ;;  %v3185_v11 = vld [vmem:[#allocation6 + $0x5e4] ss:$16 sps:$4 sm:$0xff]   ;;  %v3186_v14 = vld [vmem:[#allocation6 + $0x1e8] ss:$16 sps:$4 sm:$0xff]  }
  0x7f   :  { %1765 = vmatprep.subr.bf16.mxu0 %v3101_v13  ;;  %1881 = vmatprep.mubr.bf16.mxu1 %v2616_v54  ;;  %v3153_v54 = vld [vmem:[#allocation6 + $0x540] ss:$16 sps:$4 sm:$0xff]  }
  0x80   :  { %1795 = vmatprep.mubr.bf16.mxu0 %v3677_v39  ;;  %v3183_v13 = vld [vmem:[#allocation6 + $0x5e0] ss:$16 sps:$4 sm:$0xff]  }
  0x81   :  { %1852 = vmatpush1.bf16.msra.mxu1 %v3102_v16  ;;  %v3194_v16 = vld [vmem:[#allocation6 + $0x20c] ss:$16 sps:$4 sm:$0xff]  }
  0x82   :  { %1766 = vmatpush1.bf16.msra.mxu0 %v3099_v15  ;;  %1853 = vmatprep.subr.bf16.mxu1 %v3110_v18  ;;  %v3191_v15 = vld [vmem:[#allocation6 + $0x604] ss:$16 sps:$4 sm:$0xff]   ;;  %v3189_v18 = vld [vmem:[#allocation6 + $0x600] ss:$16 sps:$4 sm:$0xff]  }
  0x83   :  { %1767 = vmatprep.subr.bf16.mxu0 %v3107_v17  ;;  %v3682_v17 = vcombine.low %v3671_v35, %v3673_v36  ;;  %v3218_v35 = vld [vmem:[#allocation6 + $0x28c] ss:$16 sps:$4 sm:$0xff]   ;;  %v3213_v36 = vld [vmem:[#allocation6 + $0x680] ss:$16 sps:$4 sm:$0xff]  }
  0x85   :  { %1854 = vmatpush1.bf16.msra.mxu1 %v3108_v20  ;;  %v3197_v20 = vld [vmem:[#allocation6 + $0x624] ss:$16 sps:$4 sm:$0xff]  }
  0x86   :  { %1768 = vmatpush1.bf16.msra.mxu0 %v3105_v19  ;;  %1855 = vmatprep.subr.bf16.mxu1 %v3116_v22  ;;  %v3192_v19 = vld [vmem:[#allocation6 + $0x208] ss:$16 sps:$4 sm:$0xff]  }
  0x87   :  { %1769 = vmatprep.subr.bf16.mxu0 %v3113_v21  ;;  %v3200_v21 = vld [vmem:[#allocation6 + $0x22c] ss:$16 sps:$4 sm:$0xff]  }
  0x88   :  { %v3684_v22 = vld [vmem:[#allocation3 + $0x18] sm:$0xff] }
  0x89   :  { %1856 = vmatpush1.bf16.msra.mxu1 %v3114_v24  ;;  %v3195_v24 = vld [vmem:[#allocation6 + $0x620] ss:$16 sps:$4 sm:$0xff]  }
  0x8a   :  { %1770 = vmatpush1.bf16.msra.mxu0 %v3111_v23  ;;  %1857 = vmatprep.subr.bf16.mxu1 %v3122_v26  ;;  %v3686_v23 = vld [vmem:[#allocation3 + $0x38] sm:$0xff] }
  0x8b   :  { %1771 = vmatprep.subr.bf16.mxu0 %v3119_v25  ;;  %v3198_v25 = vld [vmem:[#allocation6 + $0x228] ss:$16 sps:$4 sm:$0xff]   ;;  %v3692_v26 = vcombine.high %v3684_v22, %v3686_v23 }
  0x8d   :  { %1858 = vmatpush1.bf16.msra.mxu1 %v3120_v28  ;;  %v3206_v28 = vld [vmem:[#allocation6 + $0x24c] ss:$16 sps:$4 sm:$0xff]  }
  0x8e   :  { %1772 = vmatpush1.bf16.msra.mxu0 %v3117_v27  ;;  %1859 = vmatprep.subr.bf16.mxu1 %v3128_v30  ;;  %v3203_v27 = vld [vmem:[#allocation6 + $0x644] ss:$16 sps:$4 sm:$0xff]   ;;  %v3204_v30 = vld [vmem:[#allocation6 + $0x248] ss:$16 sps:$4 sm:$0xff]  }
  0x8f   :  { %1773 = vmatprep.subr.bf16.mxu0 %v3125_v29  ;;  %v3201_v29 = vld [vmem:[#allocation6 + $0x640] ss:$16 sps:$4 sm:$0xff]  }
  0x91   :  { %1860 = vmatpush1.bf16.msra.mxu1 %v3126_v32  ;;  %v3207_v32 = vld [vmem:[#allocation6 + $0x660] ss:$16 sps:$4 sm:$0xff]  }
  0x92   :  { %1774 = vmatpush1.bf16.msra.mxu0 %v3123_v31  ;;  %1861 = vmatprep.subr.bf16.mxu1 %v3134_v34  ;;  %v3212_v31 = vld [vmem:[#allocation6 + $0x26c] ss:$16 sps:$4 sm:$0xff]   ;;  %v3215_v34 = vld [vmem:[#allocation6 + $0x684] ss:$16 sps:$4 sm:$0xff]  }
  0x93   :  { %1775 = vmatprep.subr.bf16.mxu0 %v3131_v33  ;;  %v3210_v33 = vld [vmem:[#allocation6 + $0x268] ss:$16 sps:$4 sm:$0xff]  }
  0x95   :  { %1862 = vmatpush1.bf16.msra.mxu1 %v3132_v38  ;;  %v3224_v38 = vld [vmem:[#allocation6 + $0x2ac] ss:$16 sps:$4 sm:$0xff]  }
  0x96   :  { %1776 = vmatpush1.bf16.msra.mxu0 %v3129_v37  ;;  %1863 = vmatprep.subr.bf16.mxu1 %v3140_v41  ;;  %v3216_v37 = vld [vmem:[#allocation6 + $0x288] ss:$16 sps:$4 sm:$0xff]  }
  0x97   :  { %1777 = vmatprep.subr.bf16.mxu0 %v3137_v40  ;;  %v3219_v40 = vld [vmem:[#allocation6 + $0x6a0] ss:$16 sps:$4 sm:$0xff]   ;;  %v3222_v41 = vld [vmem:[#allocation6 + $0x2a8] ss:$16 sps:$4 sm:$0xff]  }
  0x99   :  { %1864 = vmatpush1.bf16.msra.mxu1 %v3138_v43  ;;  %v3230_v43 = vld [vmem:[#allocation6 + $0x2cc] ss:$16 sps:$4 sm:$0xff]  }
  0x9a   :  { %1778 = vmatpush1.bf16.msra.mxu0 %v3135_v42  ;;  %1865 = vmatprep.subr.bf16.mxu1 %v3146_v45  ;;  %v3227_v42 = vld [vmem:[#allocation6 + $0x6c4] ss:$16 sps:$4 sm:$0xff]   ;;  %v3228_v45 = vld [vmem:[#allocation6 + $0x2c8] ss:$16 sps:$4 sm:$0xff]  }
  0x9b   :  { %1779 = vmatprep.subr.bf16.mxu0 %v3143_v44  ;;  %v3225_v44 = vld [vmem:[#allocation6 + $0x6c0] ss:$16 sps:$4 sm:$0xff]  }
  0x9d   :  { %1866 = vmatpush1.bf16.msra.mxu1 %v3144_v47  ;;  %v3236_v47 = vld [vmem:[#allocation6 + $0x2ec] ss:$16 sps:$4 sm:$0xff]  }
  0x9e   :  { %1780 = vmatpush1.bf16.msra.mxu0 %v3141_v46  ;;  %1867 = vmatprep.subr.bf16.mxu1 %v3152_v49  ;;  %v3233_v46 = vld [vmem:[#allocation6 + $0x6e4] ss:$16 sps:$4 sm:$0xff]   ;;  %v3234_v49 = vld [vmem:[#allocation6 + $0x2e8] ss:$16 sps:$4 sm:$0xff]  }
  0x9f   :  { %1781 = vmatprep.subr.bf16.mxu0 %v3149_v48  ;;  %v3231_v48 = vld [vmem:[#allocation6 + $0x6e0] ss:$16 sps:$4 sm:$0xff]  }
  0xa1   :  { %1868 = vmatpush1.bf16.msra.mxu1 %v3150_v51  ;;  %v3242_v51 = vld [vmem:[#allocation6 + $0x30c] ss:$16 sps:$4 sm:$0xff]  }
  0xa2   :  { %1782 = vmatpush1.bf16.msra.mxu0 %v3147_v50  ;;  %1869 = vmatprep.subr.bf16.mxu1 %v3158_v53  ;;  %v3239_v50 = vld [vmem:[#allocation6 + $0x704] ss:$16 sps:$4 sm:$0xff]   ;;  %v3240_v53 = vld [vmem:[#allocation6 + $0x308] ss:$16 sps:$4 sm:$0xff]  }
  0xa3   :  { %1783 = vmatprep.subr.bf16.mxu0 %v3155_v52  ;;  %v3237_v52 = vld [vmem:[#allocation6 + $0x700] ss:$16 sps:$4 sm:$0xff]  }
  0xa5   :  { %1870 = vmatpush1.bf16.msra.mxu1 %v3156_v55  ;;  %v3248_v55 = vld [vmem:[#allocation6 + $0x32c] ss:$16 sps:$4 sm:$0xff]  }
  0xa6   :  { %1784 = vmatpush1.bf16.msra.mxu0 %v3153_v54  ;;  %1871 = vmatprep.subr.bf16.mxu1 %v3164_v58  ;;  %v3245_v54 = vld [vmem:[#allocation6 + $0x724] ss:$16 sps:$4 sm:$0xff]   ;;  %v3246_v58 = vld [vmem:[#allocation6 + $0x328] ss:$16 sps:$4 sm:$0xff]  }
  0xa7   :  { %1785 = vmatprep.subr.bf16.mxu0 %v3161_v57  ;;  %v3243_v57 = vld [vmem:[#allocation6 + $0x720] ss:$16 sps:$4 sm:$0xff]  }
  0xa9   :  { %1872 = vmatpush1.bf16.msra.mxu1 %v3162_v60  ;;  %v3254_v60 = vld [vmem:[#allocation6 + $0x34c] ss:$16 sps:$4 sm:$0xff]  }
  0xaa   :  { %1786 = vmatpush1.bf16.msra.mxu0 %v3159_v59  ;;  %1873 = vmatprep.subr.bf16.mxu1 %v3170_v62  ;;  %v3251_v59 = vld [vmem:[#allocation6 + $0x744] ss:$16 sps:$4 sm:$0xff]   ;;  %v3252_v62 = vld [vmem:[#allocation6 + $0x348] ss:$16 sps:$4 sm:$0xff]  }
  0xab   :  { %1787 = vmatprep.subr.bf16.mxu0 %v3167_v61  ;;  %v3249_v61 = vld [vmem:[#allocation6 + $0x740] ss:$16 sps:$4 sm:$0xff]  }
  0xad   :  { %1874 = vmatpush1.bf16.msra.mxu1 %v3168_v0  ;;  %v3260_v0 = vld [vmem:[#allocation6 + $0x36c] ss:$16 sps:$4 sm:$0xff]  }
  0xae   :  { %1788 = vmatpush1.bf16.msra.mxu0 %v3165_v63  ;;  %1875 = vmatprep.subr.bf16.mxu1 %v3176_v2  ;;  %v3257_v63 = vld [vmem:[#allocation6 + $0x764] ss:$16 sps:$4 sm:$0xff]   ;;  %v3258_v2 = vld [vmem:[#allocation6 + $0x368] ss:$16 sps:$4 sm:$0xff]  }
  0xaf   :  { %1789 = vmatprep.subr.bf16.mxu0 %v3173_v1  ;;  %v3255_v1 = vld [vmem:[#allocation6 + $0x760] ss:$16 sps:$4 sm:$0xff]  }
  0xb1   :  { %1876 = vmatpush1.bf16.msra.mxu1 %v3174_v4  ;;  %v3266_v4 = vld [vmem:[#allocation6 + $0x38c] ss:$16 sps:$4 sm:$0xff]  }
  0xb2   :  { %1790 = vmatpush1.bf16.msra.mxu0 %v3171_v3  ;;  %1877 = vmatprep.subr.bf16.mxu1 %v3182_v6  ;;  %v3263_v3 = vld [vmem:[#allocation6 + $0x784] ss:$16 sps:$4 sm:$0xff]   ;;  %v3264_v6 = vld [vmem:[#allocation6 + $0x388] ss:$16 sps:$4 sm:$0xff]  }
  0xb3   :  { %1791 = vmatprep.subr.bf16.mxu0 %v3179_v5  ;;  %v3261_v5 = vld [vmem:[#allocation6 + $0x780] ss:$16 sps:$4 sm:$0xff]  }
  0xb5   :  { %1878 = vmatpush1.bf16.msra.mxu1 %v3180_v8  ;;  %v3272_v8 = vld [vmem:[#allocation6 + $0x3ac] ss:$16 sps:$4 sm:$0xff]  }
  0xb6   :  { %1792 = vmatpush1.bf16.msra.mxu0 %v3177_v7  ;;  %1879 = vmatprep.subr.bf16.mxu1 %v3188_v12  ;;  %v3269_v7 = vld [vmem:[#allocation6 + $0x7a4] ss:$16 sps:$4 sm:$0xff]   ;;  %v3270_v12 = vld [vmem:[#allocation6 + $0x3a8] ss:$16 sps:$4 sm:$0xff]  }
  0xb7   :  { %1793 = vmatprep.subr.bf16.mxu0 %v3185_v11  ;;  %v3267_v11 = vld [vmem:[#allocation6 + $0x7a0] ss:$16 sps:$4 sm:$0xff]  }
  0xb9   :  { %1880 = vmatpush1.bf16.msra.mxu1 %v3186_v14  ;;  %v3278_v14 = vld [vmem:[#allocation6 + $0x3cc] ss:$16 sps:$4 sm:$0xff]  }
  0xba   :  { %1794 = vmatpush1.bf16.msra.mxu0 %v3183_v13  ;;  %1892 = vmatprep.subr.bf16.mxu1 %v3194_v16  ;;  %v3275_v13 = vld [vmem:[#allocation6 + $0x7c4] ss:$16 sps:$4 sm:$0xff]   ;;  %v3276_v16 = vld [vmem:[#allocation6 + $0x3c8] ss:$16 sps:$4 sm:$0xff]  }
  0xbb   :  { %1806 = vmatprep.subr.bf16.mxu0 %v3191_v15  ;;  %v3273_v15 = vld [vmem:[#allocation6 + $0x7c0] ss:$16 sps:$4 sm:$0xff]  }
  0xbc   :  { %1882 = vmatmul.mubr.bf16.vlgmr.msra.gmra.mrb[4].mxu1 %v3665_v9  ;;  %v3209_v9 = vld [vmem:[#allocation6 + $0x664] ss:$16 sps:$4 sm:$0xff]  }
  0xbd   :  { %1796 = vmatmul.mubr.bf16.vlgmr.msra.gmra.mrb[0].mxu0 %v3682_v17  ;;  %1893 = vmatpush1.bf16.msra.mxu1 %v3192_v19  ;;  %v3284_v19 = vld [vmem:[#allocation6 + $0x3ec] ss:$16 sps:$4 sm:$0xff]  }
  0xbe   :  { %1807 = vmatpush1.bf16.msra.mxu0 %v3189_v18  ;;  %1894 = vmatprep.subr.bf16.mxu1 %v3200_v21  ;;  %v3281_v18 = vld [vmem:[#allocation6 + $0x7e4] ss:$16 sps:$4 sm:$0xff]   ;;  %v3282_v21 = vld [vmem:[#allocation6 + $0x3e8] ss:$16 sps:$4 sm:$0xff]  }
  0xbf   :  { %1808 = vmatprep.subr.bf16.mxu0 %v3197_v20  ;;  %1838 = vmatprep.mubr.bf16.mxu0 %v3692_v26  ;;  %v3279_v20 = vld [vmem:[#allocation6 + $0x7e0] ss:$16 sps:$4 sm:$0xff]  }
  0xc0   :  { %1924 = vmatprep.mubr.bf16.mxu1 %v3662_v56  ;;  %v3221_v56 = vld [vmem:[#allocation6 + $0x6a4] ss:$16 sps:$4 sm:$0xff]  }
  0xc1   :  { %1895 = vmatpush1.bf16.msra.mxu1 %v3198_v25  ;;  %v3285_v25 = vld [vmem:[#allocation6 + $0x408] ss:$16 sps:$4 sm:$0xff]  }
  0xc2   :  { %1809 = vmatpush1.bf16.msra.mxu0 %v3195_v24  ;;  %1896 = vmatprep.subr.bf16.mxu1 %v3206_v28  ;;  %v3287_v24 = vld [vmem:[#allocation6 + $0x40c] ss:$16 sps:$4 sm:$0xff]  }
  0xc3   :  { %1810 = vmatprep.subr.bf16.mxu0 %v3203_v27  ;;  %v3698_v27 = vcombine.low %v3684_v22, %v3686_v23  ;;  %v3290_v28 = vld [vmem:[#allocation6 + $0x42c] ss:$16 sps:$4 sm:$0xff]   ;;  %v3384_v22 = vld [vmem:[#allocation8 + $0x10] ss:$8 sps:$4 sm:$0xff]  }
  0xc4   :  { %v3389_v23 = vld [vmem:[#allocation8 + $0x24] ss:$8 sps:$4 sm:$0xff]  }
  0xc5   :  { %1897 = vmatpush1.bf16.msra.mxu1 %v3204_v30  ;;  %v3383_v30 = vld [vmem:[#allocation8 + $0x4] ss:$8 sps:$4 sm:$0xff]  }
  0xc6   :  { %1811 = vmatpush1.bf16.msra.mxu0 %v3201_v29  ;;  %1898 = vmatprep.subr.bf16.mxu1 %v3212_v31  ;;  %v3381_v29 = vld [vmem:[#allocation8] ss:$8 sps:$4 sm:$0xff]   ;;  %v3386_v31 = vld [vmem:[#allocation8 + $0x14] ss:$8 sps:$4 sm:$0xff]  }
  0xc7   :  { %1812 = vmatprep.subr.bf16.mxu0 %v3209_v9  ;;  %v3288_v9 = vld [vmem:[#allocation6 + $0x428] ss:$16 sps:$4 sm:$0xff]  }
  0xc9   :  { %1899 = vmatpush1.bf16.msra.mxu1 %v3210_v33  ;;  %v3291_v33 = vld [vmem:[#allocation6 + $0x448] ss:$16 sps:$4 sm:$0xff]  }
  0xca   :  { %1813 = vmatpush1.bf16.msra.mxu0 %v3207_v32  ;;  %1900 = vmatprep.subr.bf16.mxu1 %v3218_v35  ;;  %v3293_v32 = vld [vmem:[#allocation6 + $0x44c] ss:$16 sps:$4 sm:$0xff]  }
  0xcb   :  { %1814 = vmatprep.subr.bf16.mxu0 %v3215_v34  ;;  %v3296_v34 = vld [vmem:[#allocation6 + $0x46c] ss:$16 sps:$4 sm:$0xff]  }
  0xcc   :  { %v3392_v35 = vld [vmem:[#allocation8 + $0x34] ss:$8 sps:$4 sm:$0xff]  }
  0xcd   :  { %1901 = vmatpush1.bf16.msra.mxu1 %v3216_v37  ;;  %v3390_v37 = vld [vmem:[#allocation8 + $0x30] ss:$8 sps:$4 sm:$0xff]  }
  0xce   :  { %1815 = vmatpush1.bf16.msra.mxu0 %v3213_v36  ;;  %1902 = vmatprep.subr.bf16.mxu1 %v3224_v38  ;;  %v3294_v36 = vld [vmem:[#allocation6 + $0x468] ss:$16 sps:$4 sm:$0xff]  }
  0xcf   :  { %1816 = vmatprep.subr.bf16.mxu0 %v3221_v56  ;;  %v3395_v56 = vld [vmem:[#allocation8 + $0x44] ss:$8 sps:$4 sm:$0xff]   ;;  %v3297_v38 = vld [vmem:[#allocation6 + $0x488] ss:$16 sps:$4 sm:$0xff]  }
  0xd1   :  { %1903 = vmatpush1.bf16.msra.mxu1 %v3222_v41  ;;  %v3393_v41 = vld [vmem:[#allocation8 + $0x40] ss:$8 sps:$4 sm:$0xff]  }
  0xd2   :  { %1817 = vmatpush1.bf16.msra.mxu0 %v3219_v40  ;;  %1904 = vmatprep.subr.bf16.mxu1 %v3230_v43  ;;  %v3302_v40 = vld [vmem:[#allocation6 + $0x4ac] ss:$16 sps:$4 sm:$0xff]   ;;  %v3300_v43 = vld [vmem:[#allocation6 + $0x4a8] ss:$16 sps:$4 sm:$0xff]  }
  0xd3   :  { %1818 = vmatprep.subr.bf16.mxu0 %v3227_v42  ;;  %v3398_v42 = vld [vmem:[#allocation8 + $0x54] ss:$8 sps:$4 sm:$0xff]  }
  0xd5   :  { %1905 = vmatpush1.bf16.msra.mxu1 %v3228_v45  ;;  %v3396_v45 = vld [vmem:[#allocation8 + $0x50] ss:$8 sps:$4 sm:$0xff]  }
  0xd6   :  { %1819 = vmatpush1.bf16.msra.mxu0 %v3225_v44  ;;  %1906 = vmatprep.subr.bf16.mxu1 %v3236_v47  ;;  %v3305_v44 = vld [vmem:[#allocation6 + $0x4cc] ss:$16 sps:$4 sm:$0xff]   ;;  %v3303_v47 = vld [vmem:[#allocation6 + $0x4c8] ss:$16 sps:$4 sm:$0xff]  }
  0xd7   :  { %1820 = vmatprep.subr.bf16.mxu0 %v3233_v46  ;;  %v3401_v46 = vld [vmem:[#allocation8 + $0x64] ss:$8 sps:$4 sm:$0xff]  }
  0xd9   :  { %1907 = vmatpush1.bf16.msra.mxu1 %v3234_v49  ;;  %v3399_v49 = vld [vmem:[#allocation8 + $0x60] ss:$8 sps:$4 sm:$0xff]  }
  0xda   :  { %1821 = vmatpush1.bf16.msra.mxu0 %v3231_v48  ;;  %1908 = vmatprep.subr.bf16.mxu1 %v3242_v51  ;;  %v3308_v48 = vld [vmem:[#allocation6 + $0x4ec] ss:$16 sps:$4 sm:$0xff]   ;;  %v3306_v51 = vld [vmem:[#allocation6 + $0x4e8] ss:$16 sps:$4 sm:$0xff]  }
  0xdb   :  { %1822 = vmatprep.subr.bf16.mxu0 %v3239_v50  ;;  %v3404_v50 = vld [vmem:[#allocation8 + $0x74] ss:$8 sps:$4 sm:$0xff]  }
  0xdd   :  { %1909 = vmatpush1.bf16.msra.mxu1 %v3240_v53  ;;  %v3402_v53 = vld [vmem:[#allocation8 + $0x70] ss:$8 sps:$4 sm:$0xff]  }
  0xde   :  { %1823 = vmatpush1.bf16.msra.mxu0 %v3237_v52  ;;  %1910 = vmatprep.subr.bf16.mxu1 %v3248_v55  ;;  %v3311_v52 = vld [vmem:[#allocation6 + $0x50c] ss:$16 sps:$4 sm:$0xff]   ;;  %v3309_v55 = vld [vmem:[#allocation6 + $0x508] ss:$16 sps:$4 sm:$0xff]  }
  0xdf   :  { %1824 = vmatprep.subr.bf16.mxu0 %v3245_v54  ;;  %v3407_v54 = vld [vmem:[#allocation8 + $0x84] ss:$8 sps:$4 sm:$0xff]  }
  0xe1   :  { %1911 = vmatpush1.bf16.msra.mxu1 %v3246_v58  ;;  %v3405_v58 = vld [vmem:[#allocation8 + $0x80] ss:$8 sps:$4 sm:$0xff]  }
  0xe2   :  { %1825 = vmatpush1.bf16.msra.mxu0 %v3243_v57  ;;  %1912 = vmatprep.subr.bf16.mxu1 %v3254_v60  ;;  %v3314_v57 = vld [vmem:[#allocation6 + $0x52c] ss:$16 sps:$4 sm:$0xff]   ;;  %v3312_v60 = vld [vmem:[#allocation6 + $0x528] ss:$16 sps:$4 sm:$0xff]  }
  0xe3   :  { %1826 = vmatprep.subr.bf16.mxu0 %v3251_v59  ;;  %v3410_v59 = vld [vmem:[#allocation8 + $0x94] ss:$8 sps:$4 sm:$0xff]  }
  0xe5   :  { %1913 = vmatpush1.bf16.msra.mxu1 %v3252_v62  ;;  %v3408_v62 = vld [vmem:[#allocation8 + $0x90] ss:$8 sps:$4 sm:$0xff]  }
  0xe6   :  { %1827 = vmatpush1.bf16.msra.mxu0 %v3249_v61  ;;  %1914 = vmatprep.subr.bf16.mxu1 %v3260_v0  ;;  %v3317_v61 = vld [vmem:[#allocation6 + $0x54c] ss:$16 sps:$4 sm:$0xff]   ;;  %v3315_v0 = vld [vmem:[#allocation6 + $0x548] ss:$16 sps:$4 sm:$0xff]  }
  0xe7   :  { %1828 = vmatprep.subr.bf16.mxu0 %v3257_v63  ;;  %v3413_v63 = vld [vmem:[#allocation8 + $0xa4] ss:$8 sps:$4 sm:$0xff]  }
  0xe9   :  { %1915 = vmatpush1.bf16.msra.mxu1 %v3258_v2  ;;  %v3411_v2 = vld [vmem:[#allocation8 + $0xa0] ss:$8 sps:$4 sm:$0xff]  }
  0xea   :  { %1829 = vmatpush1.bf16.msra.mxu0 %v3255_v1  ;;  %1916 = vmatprep.subr.bf16.mxu1 %v3266_v4  ;;  %v3320_v1 = vld [vmem:[#allocation6 + $0x56c] ss:$16 sps:$4 sm:$0xff]   ;;  %v3318_v4 = vld [vmem:[#allocation6 + $0x568] ss:$16 sps:$4 sm:$0xff]  }
  0xeb   :  { %1830 = vmatprep.subr.bf16.mxu0 %v3263_v3  ;;  %v3416_v3 = vld [vmem:[#allocation8 + $0xb4] ss:$8 sps:$4 sm:$0xff]  }
  0xed   :  { %1917 = vmatpush1.bf16.msra.mxu1 %v3264_v6  ;;  %v3414_v6 = vld [vmem:[#allocation8 + $0xb0] ss:$8 sps:$4 sm:$0xff]  }
  0xee   :  { %1831 = vmatpush1.bf16.msra.mxu0 %v3261_v5  ;;  %1918 = vmatprep.subr.bf16.mxu1 %v3272_v8  ;;  %v3323_v5 = vld [vmem:[#allocation6 + $0x58c] ss:$16 sps:$4 sm:$0xff]   ;;  %v3321_v8 = vld [vmem:[#allocation6 + $0x588] ss:$16 sps:$4 sm:$0xff]  }
  0xef   :  { %1832 = vmatprep.subr.bf16.mxu0 %v3269_v7  ;;  %v3419_v7 = vld [vmem:[#allocation8 + $0xc4] ss:$8 sps:$4 sm:$0xff]  }
  0xf1   :  { %1919 = vmatpush1.bf16.msra.mxu1 %v3270_v12  ;;  %v3417_v12 = vld [vmem:[#allocation8 + $0xc0] ss:$8 sps:$4 sm:$0xff]  }
  0xf2   :  { %1833 = vmatpush1.bf16.msra.mxu0 %v3267_v11  ;;  %1920 = vmatprep.subr.bf16.mxu1 %v3278_v14  ;;  %v3326_v11 = vld [vmem:[#allocation6 + $0x5ac] ss:$16 sps:$4 sm:$0xff]   ;;  %v3324_v14 = vld [vmem:[#allocation6 + $0x5a8] ss:$16 sps:$4 sm:$0xff]  }
  0xf3   :  { %1834 = vmatprep.subr.bf16.mxu0 %v3275_v13  ;;  %v3422_v13 = vld [vmem:[#allocation8 + $0xd4] ss:$8 sps:$4 sm:$0xff]  }
  0xf5   :  { %1921 = vmatpush1.bf16.msra.mxu1 %v3276_v16  ;;  %v3420_v16 = vld [vmem:[#allocation8 + $0xd0] ss:$8 sps:$4 sm:$0xff]  }
  0xf6   :  { %1835 = vmatpush1.bf16.msra.mxu0 %v3273_v15  ;;  %1922 = vmatprep.subr.bf16.mxu1 %v3284_v19  ;;  %v3329_v15 = vld [vmem:[#allocation6 + $0x5cc] ss:$16 sps:$4 sm:$0xff]  }
  0xf7   :  { %1836 = vmatprep.subr.bf16.mxu0 %v3281_v18  ;;  %v3327_v18 = vld [vmem:[#allocation6 + $0x5c8] ss:$16 sps:$4 sm:$0xff]   ;;  %v3332_v19 = vld [vmem:[#allocation6 + $0x5ec] ss:$16 sps:$4 sm:$0xff]  }
  0xf9   :  { %1923 = vmatpush1.bf16.msra.mxu1 %v3282_v21  ;;  %v3335_v21 = vld [vmem:[#allocation6 + $0x60c] ss:$16 sps:$4 sm:$0xff]  }
  0xfa   :  { %1837 = vmatpush1.bf16.msra.mxu0 %v3279_v20  ;;  %1935 = vmatprep.subr.bf16.mxu1 %v3287_v24  ;;  %v3330_v20 = vld [vmem:[#allocation6 + $0x5e8] ss:$16 sps:$4 sm:$0xff]  }
  0xfb   :  { %2429 = vmatprep.subr.bf16.mxu0 %v3383_v30  ;;  %v3333_v24 = vld [vmem:[#allocation6 + $0x608] ss:$16 sps:$4 sm:$0xff]  }
  0xfc   :  { %1925 = vmatmul.mubr.bf16.vlgmr.msra.gmra.mrb[4].mxu1 %v3667_v10  ;;  %v3387_v10 = vld [vmem:[#allocation8 + $0x20] ss:$8 sps:$4 sm:$0xff]  }
  0xfd   :  { %1839 = vmatmul.mubr.bf16.vlgmr.msra.gmra.mrb[0].mxu0 %v3698_v27  ;;  %1936 = vmatpush1.bf16.msra.mxu1 %v3285_v25  ;;  %v3338_v25 = vld [vmem:[#allocation6 + $0x62c] ss:$16 sps:$4 sm:$0xff]   ;;  %v3339_v30 = vld [vmem:[#allocation6 + $0x648] ss:$16 sps:$4 sm:$0xff]  }
  0xfe   :  { %1967 = vmatprep.mubr.bf16.mxu1 %v3677_v39  ;;  %1937 = vmatprep.subr.bf16.mxu1 %v3290_v28  ;;  %v3299_v39 = vld [vmem:[#allocation6 + $0x48c] ss:$16 sps:$4 sm:$0xff]   ;;  %v3336_v28 = vld [vmem:[#allocation6 + $0x628] ss:$16 sps:$4 sm:$0xff]  }
  0xff   :  { %2430 = vmatpush1.bf16.msra.mxu0 %v3381_v29  ;;  %v3341_v29 = vld [vmem:[#allocation6 + $0x64c] ss:$16 sps:$4 sm:$0xff]  }
 0x100   :  { %2431 = vmatprep.subr.bf16.mxu0 %v3386_v31  ;;  %v3342_v31 = vld [vmem:[#allocation6 + $0x668] ss:$16 sps:$4 sm:$0xff]  }
 0x101   :  { %1938 = vmatpush1.bf16.msra.mxu1 %v3288_v9  ;;  %v3344_v9 = vld [vmem:[#allocation6 + $0x66c] ss:$16 sps:$4 sm:$0xff]  }
 0x102   :  { %1939 = vmatprep.subr.bf16.mxu1 %v3293_v32  ;;  %v3347_v32 = vld [vmem:[#allocation6 + $0x68c] ss:$16 sps:$4 sm:$0xff]  }
 0x103   :  { %2432 = vmatpush1.bf16.msra.mxu0 %v3384_v22  ;;  %v3345_v22 = vld [vmem:[#allocation6 + $0x688] ss:$16 sps:$4 sm:$0xff]  }
 0x104   :  { %2433 = vmatprep.subr.bf16.mxu0 %v3389_v23  ;;  %v3350_v23 = vld [vmem:[#allocation6 + $0x6ac] ss:$16 sps:$4 sm:$0xff]  }
 0x105   :  { %1940 = vmatpush1.bf16.msra.mxu1 %v3291_v33  ;;  %v3353_v33 = vld [vmem:[#allocation6 + $0x6cc] ss:$16 sps:$4 sm:$0xff]  }
 0x106   :  { %1941 = vmatprep.subr.bf16.mxu1 %v3296_v34 }
 0x107   :  { %2434 = vmatpush1.bf16.msra.mxu0 %v3387_v10  ;;  %v3425_v10 = vld [vmem:[#allocation8 + $0xe4] ss:$8 sps:$4 sm:$0xff]  }
 0x108   :  { %2435 = vmatprep.subr.bf16.mxu0 %v3392_v35 }
 0x109   :  { %1942 = vmatpush1.bf16.msra.mxu1 %v3294_v36  ;;  %v3351_v36 = vld [vmem:[#allocation6 + $0x6c8] ss:$16 sps:$4 sm:$0xff]  }
 0x10a   :  { %1943 = vmatprep.subr.bf16.mxu1 %v3299_v39  ;;  %v3423_v39 = vld [vmem:[#allocation8 + $0xe0] ss:$8 sps:$4 sm:$0xff]  }
 0x10b   :  { %2436 = vmatpush1.bf16.msra.mxu0 %v3390_v37 }
 0x10c   :  { %2437 = vmatprep.subr.bf16.mxu0 %v3395_v56  ;;  %v3356_v56 = vld [vmem:[#allocation6 + $0x6ec] ss:$16 sps:$4 sm:$0xff]  }
 0x10d   :  { %1944 = vmatpush1.bf16.msra.mxu1 %v3297_v38  ;;  %v3428_v38 = vld [vmem:[#allocation8 + $0xf4] ss:$8 sps:$4 sm:$0xff]  }
 0x10e   :  { %1945 = vmatprep.subr.bf16.mxu1 %v3302_v40  ;;  %v3354_v40 = vld [vmem:[#allocation6 + $0x6e8] ss:$16 sps:$4 sm:$0xff]  }
 0x10f   :  { %2438 = vmatpush1.bf16.msra.mxu0 %v3393_v41  ;;  %v3426_v41 = vld [vmem:[#allocation8 + $0xf0] ss:$8 sps:$4 sm:$0xff]  }
 0x110   :  { %2439 = vmatprep.subr.bf16.mxu0 %v3398_v42  ;;  %v3359_v42 = vld [vmem:[#allocation6 + $0x70c] ss:$16 sps:$4 sm:$0xff]  }
 0x111   :  { %1946 = vmatpush1.bf16.msra.mxu1 %v3300_v43  ;;  %v3357_v43 = vld [vmem:[#allocation6 + $0x708] ss:$16 sps:$4 sm:$0xff]  }
 0x112   :  { %1947 = vmatprep.subr.bf16.mxu1 %v3305_v44  ;;  %v3362_v44 = vld [vmem:[#allocation6 + $0x72c] ss:$16 sps:$4 sm:$0xff]  }
 0x113   :  { %2440 = vmatpush1.bf16.msra.mxu0 %v3396_v45  ;;  %v3431_v45 = vld [vmem:[#allocation8 + $0x104] ss:$8 sps:$4 sm:$0xff]  }
 0x114   :  { %2441 = vmatprep.subr.bf16.mxu0 %v3401_v46  ;;  %v3360_v46 = vld [vmem:[#allocation6 + $0x728] ss:$16 sps:$4 sm:$0xff]  }
 0x115   :  { %1948 = vmatpush1.bf16.msra.mxu1 %v3303_v47  ;;  %v3365_v47 = vld [vmem:[#allocation6 + $0x74c] ss:$16 sps:$4 sm:$0xff]  }
 0x116   :  { %1949 = vmatprep.subr.bf16.mxu1 %v3308_v48  ;;  %v3363_v48 = vld [vmem:[#allocation6 + $0x748] ss:$16 sps:$4 sm:$0xff]  }
 0x117   :  { %2442 = vmatpush1.bf16.msra.mxu0 %v3399_v49  ;;  %v3368_v49 = vld [vmem:[#allocation6 + $0x76c] ss:$16 sps:$4 sm:$0xff]  }
 0x118   :  { %2443 = vmatprep.subr.bf16.mxu0 %v3404_v50  ;;  %v3366_v50 = vld [vmem:[#allocation6 + $0x768] ss:$16 sps:$4 sm:$0xff]  }
 0x119   :  { %1950 = vmatpush1.bf16.msra.mxu1 %v3306_v51  ;;  %v3371_v51 = vld [vmem:[#allocation6 + $0x78c] ss:$16 sps:$4 sm:$0xff]  }
 0x11a   :  { %1951 = vmatprep.subr.bf16.mxu1 %v3311_v52  ;;  %v3369_v52 = vld [vmem:[#allocation6 + $0x788] ss:$16 sps:$4 sm:$0xff]  }
 0x11b   :  { %2444 = vmatpush1.bf16.msra.mxu0 %v3402_v53  ;;  %v3374_v53 = vld [vmem:[#allocation6 + $0x7ac] ss:$16 sps:$4 sm:$0xff]  }
 0x11c   :  { %2445 = vmatprep.subr.bf16.mxu0 %v3407_v54  ;;  %v3372_v54 = vld [vmem:[#allocation6 + $0x7a8] ss:$16 sps:$4 sm:$0xff]  }
 0x11d   :  { %1952 = vmatpush1.bf16.msra.mxu1 %v3309_v55  ;;  %v3377_v55 = vld [vmem:[#allocation6 + $0x7cc] ss:$16 sps:$4 sm:$0xff]  }
 0x11e   :  { %1953 = vmatprep.subr.bf16.mxu1 %v3314_v57  ;;  %v3375_v57 = vld [vmem:[#allocation6 + $0x7c8] ss:$16 sps:$4 sm:$0xff]  }
 0x11f   :  { %2446 = vmatpush1.bf16.msra.mxu0 %v3405_v58  ;;  %v3380_v58 = vld [vmem:[#allocation6 + $0x7ec] ss:$16 sps:$4 sm:$0xff]  }
 0x120   :  { %2447 = vmatprep.subr.bf16.mxu0 %v3410_v59  ;;  %v3378_v59 = vld [vmem:[#allocation6 + $0x7e8] ss:$16 sps:$4 sm:$0xff]  }
 0x121   :  { %1954 = vmatpush1.bf16.msra.mxu1 %v3312_v60  ;;  %v337_v60 = vlaneseq }
 0x122   :  { %1955 = vmatprep.subr.bf16.mxu1 %v3317_v61 }
 0x123   :  { %2448 = vmatpush1.bf16.msra.mxu0 %v3408_v62  ;;  %v3706_v61 = vshrl.u32 %v337_v60, 7 }
 0x124   :  { %2449 = vmatprep.subr.bf16.mxu0 %v3413_v63  ;;  %v3714_v63 = vld [vmem:[%s3751_s2] sm:$0xf] }
 0x125   :  { %1956 = vmatpush1.bf16.msra.mxu1 %v3315_v0  ;;  %v3709_v62 = vsub.s32 0, %v3706_v61  ;;  %v343_v0 = vsub.s32 1, %v3706_v61 }
 0x126   :  { %1957 = vmatprep.subr.bf16.mxu1 %v3320_v1 }
 0x127   :  { %2450 = vmatpush1.bf16.msra.mxu0 %v3411_v2  ;;  %v340_v1 = vrot.slane %v3714_v63, %v3709_v62 }
 0x128   :  { %2451 = vmatprep.subr.bf16.mxu0 %v3416_v3 }
 0x129   :  { %1958 = vmatpush1.bf16.msra.mxu1 %v3318_v4 }
 0x12a   :  { %1959 = vmatprep.subr.bf16.mxu1 %v3323_v5 }
 0x12b   :  { %2452 = vmatpush1.bf16.msra.mxu0 %v3414_v6 }
 0x12c   :  { %2453 = vmatprep.subr.bf16.mxu0 %v3419_v7 }
 0x12d   :  { %1960 = vmatpush1.bf16.msra.mxu1 %v3321_v8 }
 0x12e   :  { %1961 = vmatprep.subr.bf16.mxu1 %v3326_v11 }
 0x12f   :  { %2454 = vmatpush1.bf16.msra.mxu0 %v3417_v12 }
 0x130   :  { %2455 = vmatprep.subr.bf16.mxu0 %v3422_v13 }
 0x131   :  { %1962 = vmatpush1.bf16.msra.mxu1 %v3324_v14 }
 0x132   :  { %1963 = vmatprep.subr.bf16.mxu1 %v3329_v15 }
 0x133   :  { %2456 = vmatpush1.bf16.msra.mxu0 %v3420_v16 }
 0x134   :  { %2457 = vmatprep.subr.bf16.mxu0 %v3425_v10  ;;  %v3452_v10 = vld [vmem:[#allocation8 + $0x174] ss:$8 sps:$4 sm:$0xff]  }
 0x135   :  { %1964 = vmatpush1.bf16.msra.mxu1 %v3327_v18 }
 0x136   :  { %1965 = vmatprep.subr.bf16.mxu1 %v3332_v19 }
 0x137   :  { %2458 = vmatpush1.bf16.msra.mxu0 %v3423_v39  ;;  %v3453_v39 = vld [vmem:[#allocation8 + $0x180] ss:$8 sps:$4 sm:$0xff]  }
 0x138   :  { %2459 = vmatprep.subr.bf16.mxu0 %v3428_v38  ;;  %v3461_v38 = vld [vmem:[#allocation8 + $0x1a4] ss:$8 sps:$4 sm:$0xff]  }
 0x139   :  { %1966 = vmatpush1.bf16.msra.mxu1 %v3330_v20 }
 0x13a   :  { %1978 = vmatprep.subr.bf16.mxu1 %v3335_v21 }
 0x13b   :  { %2460 = vmatpush1.bf16.msra.mxu0 %v3426_v41  ;;  %v3464_v41 = vld [vmem:[#allocation8 + $0x1b4] ss:$8 sps:$4 sm:$0xff]  }
 0x13c   :  { %1968 = vmatmul.mubr.bf16.vlgmr.msra.gmra.mrb[4].mxu1 %v3682_v17  ;;  %v3348_v17 = vld [vmem:[#allocation6 + $0x6a8] ss:$16 sps:$4 sm:$0xff]   ;;  %2472 = vmatprep.subr.bf16.mxu0 %v3431_v45  ;;  %v3470_v45 = vld [vmem:[#allocation8 + $0x1d4] ss:$8 sps:$4 sm:$0xff]  }
 0x13d   :  { %1979 = vmatpush1.bf16.msra.mxu1 %v3333_v24  ;;  %2010 = vmatprep.mubr.bf16.mxu1 %v3692_v26 }
 0x13e   :  { %1980 = vmatprep.subr.bf16.mxu1 %v3338_v25  ;;  %v3429_v25 = vld [vmem:[#allocation8 + $0x100] ss:$8 sps:$4 sm:$0xff]  }
 0x141   :  { %1981 = vmatpush1.bf16.msra.mxu1 %v3336_v28  ;;  %v3434_v28 = vld [vmem:[#allocation8 + $0x114] ss:$8 sps:$4 sm:$0xff]  }
 0x142   :  { %1982 = vmatprep.subr.bf16.mxu1 %v3341_v29  ;;  %v3432_v29 = vld [vmem:[#allocation8 + $0x110] ss:$8 sps:$4 sm:$0xff]  }
 0x145   :  { %1983 = vmatpush1.bf16.msra.mxu1 %v3339_v30  ;;  %v3437_v30 = vld [vmem:[#allocation8 + $0x124] ss:$8 sps:$4 sm:$0xff]  }
 0x146   :  { %1984 = vmatprep.subr.bf16.mxu1 %v3344_v9  ;;  %v3435_v9 = vld [vmem:[#allocation8 + $0x120] ss:$8 sps:$4 sm:$0xff]  }
 0x149   :  { %1985 = vmatpush1.bf16.msra.mxu1 %v3342_v31  ;;  %v3440_v31 = vld [vmem:[#allocation8 + $0x134] ss:$8 sps:$4 sm:$0xff]  }
 0x14a   :  { %1986 = vmatprep.subr.bf16.mxu1 %v3347_v32  ;;  %v3438_v32 = vld [vmem:[#allocation8 + $0x130] ss:$8 sps:$4 sm:$0xff]  }
 0x14d   :  { %1987 = vmatpush1.bf16.msra.mxu1 %v3345_v22  ;;  %v3443_v22 = vld [vmem:[#allocation8 + $0x144] ss:$8 sps:$4 sm:$0xff]  }
 0x14e   :  { %1988 = vmatprep.subr.bf16.mxu1 %v3350_v23  ;;  %v3441_v23 = vld [vmem:[#allocation8 + $0x140] ss:$8 sps:$4 sm:$0xff]  }
 0x14f   :  { %v1711_v34 = vpop.f32.mrb[0].mxu1 }
 0x150   :  { %v1713_v26 = vpop.f32.mrb[1].mxu1  ;;  %v1712_v2 = vadd.f32 %v1711_v34, %v340_v1  ;;  %v3449_v34 = vld [vmem:[#allocation8 + $0x164] ss:$8 sps:$4 sm:$0xff]  }
 0x151   :  { %v1715_v35 = vpop.f32.mrb[2].mxu1  ;;  %1989 = vmatpush1.bf16.msra.mxu1 %v3348_v17  ;;  %v3446_v17 = vld [vmem:[#allocation8 + $0x154] ss:$8 sps:$4 sm:$0xff]  }
 0x152   :  { %v1717_v37 = vpop.f32.mrb[3].mxu1  ;;  %1990 = vmatprep.subr.bf16.mxu1 %v3353_v33  ;;  %v1716_v5 = vadd.f32 %v1715_v35, %v340_v1  ;;  %v3444_v33 = vld [vmem:[#allocation8 + $0x150] ss:$8 sps:$4 sm:$0xff]  }
 0x153   :  { %v3450_v35 = vld [vmem:[#allocation8 + $0x170] ss:$8 sps:$4 sm:$0xff]  }
 0x155   :  { %1991 = vmatpush1.bf16.msra.mxu1 %v3351_v36  ;;  %v3455_v36 = vld [vmem:[#allocation8 + $0x184] ss:$8 sps:$4 sm:$0xff]  }
 0x156   :  { %1992 = vmatprep.subr.bf16.mxu1 %v3356_v56  ;;  %v3456_v56 = vld [vmem:[#allocation8 + $0x190] ss:$8 sps:$4 sm:$0xff]  }
 0x159   :  { %1993 = vmatpush1.bf16.msra.mxu1 %v3354_v40  ;;  %v3459_v40 = vld [vmem:[#allocation8 + $0x1a0] ss:$8 sps:$4 sm:$0xff]  }
 0x15a   :  { %1994 = vmatprep.subr.bf16.mxu1 %v3359_v42  ;;  %v3462_v42 = vld [vmem:[#allocation8 + $0x1b0] ss:$8 sps:$4 sm:$0xff]  }
 0x15d   :  { %1995 = vmatpush1.bf16.msra.mxu1 %v3357_v43  ;;  %v3467_v43 = vld [vmem:[#allocation8 + $0x1c4] ss:$8 sps:$4 sm:$0xff]  }
 0x15e   :  { %1996 = vmatprep.subr.bf16.mxu1 %v3362_v44  ;;  %v3465_v44 = vld [vmem:[#allocation8 + $0x1c0] ss:$8 sps:$4 sm:$0xff]  }
 0x161   :  { %1997 = vmatpush1.bf16.msra.mxu1 %v3360_v46  ;;  %v3468_v46 = vld [vmem:[#allocation8 + $0x1d0] ss:$8 sps:$4 sm:$0xff]  }
 0x162   :  { %1998 = vmatprep.subr.bf16.mxu1 %v3365_v47  ;;  %v3473_v47 = vld [vmem:[#allocation8 + $0x1e4] ss:$8 sps:$4 sm:$0xff]  }
 0x165   :  { %1999 = vmatpush1.bf16.msra.mxu1 %v3363_v48  ;;  %v3471_v48 = vld [vmem:[#allocation8 + $0x1e0] ss:$8 sps:$4 sm:$0xff]  }
 0x166   :  { %2000 = vmatprep.subr.bf16.mxu1 %v3368_v49  ;;  %v3476_v49 = vld [vmem:[#allocation8 + $0x1f4] ss:$8 sps:$4 sm:$0xff]  }
 0x169   :  { %2001 = vmatpush1.bf16.msra.mxu1 %v3366_v50  ;;  %v3474_v50 = vld [vmem:[#allocation8 + $0x1f0] ss:$8 sps:$4 sm:$0xff]  }
 0x16a   :  { %2002 = vmatprep.subr.bf16.mxu1 %v3371_v51  ;;  %v347_v51 = vsub.s32 2, %v3706_v61 }
 0x16d   :  { %2003 = vmatpush1.bf16.msra.mxu1 %v3369_v52  ;;  %v351_v52 = vsub.s32 3, %v3706_v61 }
 0x16e   :  { %2004 = vmatprep.subr.bf16.mxu1 %v3374_v53  ;;  %v348_v53 = vrot.slane %v3714_v63, %v347_v51 }
 0x171   :  { %2005 = vmatpush1.bf16.msra.mxu1 %v3372_v54  ;;  %v352_v54 = vrot.slane %v3714_v63, %v351_v52 }
 0x172   :  { %2006 = vmatprep.subr.bf16.mxu1 %v3377_v55 }
 0x175   :  { %2007 = vmatpush1.bf16.msra.mxu1 %v3375_v57 }
 0x176   :  { %2008 = vmatprep.subr.bf16.mxu1 %v3380_v58 }
 0x179   :  { %2009 = vmatpush1.bf16.msra.mxu1 %v3378_v59 }
 0x17c   :  { %2011 = vmatmul.mubr.bf16.vlgmr.msra.gmra.mrb[4].mxu1 %v3698_v27  ;;  %v344_v27 = vrot.slane %v3714_v63, %v343_v0  ;;  %v2943_v63 = vld.sshfl [vmem:[%s3754_s5] sm:$0x11 pattern:$0x75316420] }
 0x17e   :  { %v1714_v3 = vadd.f32 %v1713_v26, %v344_v27  ;;  %v1718_v8 = vadd.f32 %v1717_v37, %v344_v27  ;;  %v3447_v26 = vld [vmem:[#allocation8 + $0x160] ss:$8 sps:$4 sm:$0xff]   ;;  %v3458_v37 = vld [vmem:[#allocation8 + $0x194] ss:$8 sps:$4 sm:$0xff]  }
 0x1d0   :  { %v1840_v4 = vpop.f32.mrb[0].mxu0 }
 0x1d1   :  { %v2945_v6 = vadd.f32 %v1840_v4, %v1712_v2  ;;  %v1842_v7 = vpop.f32.mrb[1].mxu0 }
 0x1d2   :  { %v2947_v11 = vadd.f32 %v1842_v7, %v1714_v3  ;;  %v1844_v12 = vpop.f32.mrb[2].mxu0 }
 0x1d3   :  { %v2949_v13 = vadd.f32 %v1844_v12, %v1716_v5  ;;  %v1846_v14 = vpop.f32.mrb[3].mxu0  ;;  %v2021_v16 = vmax.f32 %v2945_v6, 0.0 }
 0x1d4   :  { %v2951_v15 = vadd.f32 %v1846_v14, %v1718_v8  ;;  %v2022_v19 = vmax.f32 %v2947_v11, 0.0  ;;  %v3580_v11 = vmov 1966171168   ;;  %v2540_v14 = vcombine.high %v2943_v63, %v2943_v63 }
 0x1d5   :  { %v2025_v18 = vmax.f32 %v2949_v13, 0.0  ;;  %v2542_v12 = vunpack.c.l.s4 %v3580_v11 }
 0x1d6   :  { %v2026_v20 = vmax.f32 %v2951_v15, 0.0 }
 0x1d7   :  { %v2029_v21 = vpack.c.bf16 %v2025_v18, %v2021_v16  ;;  %v2543_v13 = vunpack.c.0.s8 %v2542_v12 }
 0x1d8   :  { %v2030_v24 = vpack.c.bf16 %v2026_v20, %v2022_v19  ;;  %v2522_v19 = vld [vmem:[#allocation2] sm:$0x1]  ;;  %v3581_v20 = vmov 0  }
 0x1d9   :  { %v2546_v15 = vsub.s32 %v2543_v13, %v3706_v61  ;;  %2996 = vset.pattern.permute.xlu0 %v3581_v20 }
 0x1da   :  { %2461 = vmatprep.mubr.bf16.mxu0 %v2030_v24  ;;  %2525 = vperm.xlu0 %2996, %v2522_v19  }
 0x1db   :  { %2462 = vmatmul.mubr.bf16.vlgmr.msra.gmra.mrb[4].mxu0 %v2029_v21  ;;  %v2554_v16 = vrot.slane %v2540_v14, %v2546_v15  ;;  %v2547_v18 = vrot.slane %v2943_v63, %v2546_v15  ;;  %v2097_v21 = vld [vmem:[%s3753_s4] sm:$0x3]  ;;  %s3582_s4 = smov [#allocation9]  }
 0x1dc   :  { %2473 = vmatpush1.bf16.msra.mxu0 %v3429_v25  ;;  %v2102_v24 = vrot.slane %v2097_v21, %v3709_v62  ;;  %v2106_v25 = vrot.slane %v2097_v21, %v343_v0  ;;  %s2605_s5 = sshll.u32 %s3582_s4, 4  ;;  %s2606_s5 = int_to_ptr.vmem [resolvable:$true] %s2605_s5 }
 0x1dd   :  { %2474 = vmatprep.subr.bf16.mxu0 %v3434_v28  ;;  %2589 = vmatprep.mubr.bf16.mxu1 %v2554_v16  ;;  %s3543_s22 = scalar_lea.vmem %s2606_s5, 16  ;;  %s3547_s23 = scalar_lea.vmem %s2606_s5, 32 }
 0x1de   :  { %p3544_p10 = scmp.ne.s32.totalorder %s2606_s5, %s3543_s22  ;;  %p3548_p11 = scmp.lt.s32.totalorder %s2606_s5, %s2606_s5 }
 0x1df   :  { %p3549_p12 = scmp.lt.s32.totalorder %s3547_s23, %s3543_s22 }
 0x1e0   :  { %2475 = vmatpush1.bf16.msra.mxu0 %v3432_v29 }
 0x1e1   :  { %2476 = vmatprep.subr.bf16.mxu0 %v3437_v30  ;;  %p3550_p13 = por %p3549_p12, %p3548_p11 }
 0x1e3   :  { %p3551_p0 = pnand %p3550_p13, %p3544_p10 }
 0x1e4   :  { %2477 = vmatpush1.bf16.msra.mxu0 %v3435_v9 }
 0x1e5   :  { %2478 = vmatprep.subr.bf16.mxu0 %v3440_v31 }
 0x1e8   :  { %2479 = vmatpush1.bf16.msra.mxu0 %v3438_v32 }
 0x1e9   :  { %2480 = vmatprep.subr.bf16.mxu0 %v3443_v22 }
 0x1ec   :  { %2481 = vmatpush1.bf16.msra.mxu0 %v3441_v23 }
 0x1ed   :  { %2482 = vmatprep.subr.bf16.mxu0 %v3446_v17 }
 0x1f0   :  { %2483 = vmatpush1.bf16.msra.mxu0 %v3444_v33 }
 0x1f1   :  { %2484 = vmatprep.subr.bf16.mxu0 %v3449_v34 }
 0x1f4   :  { %2485 = vmatpush1.bf16.msra.mxu0 %v3447_v26 }
 0x1f5   :  { %2486 = vmatprep.subr.bf16.mxu0 %v3452_v10 }
 0x1f8   :  { %2487 = vmatpush1.bf16.msra.mxu0 %v3450_v35 }
 0x1f9   :  { %2488 = vmatprep.subr.bf16.mxu0 %v3455_v36 }
 0x1fc   :  { %2489 = vmatpush1.bf16.msra.mxu0 %v3453_v39 }
 0x1fd   :  { %2490 = vmatprep.subr.bf16.mxu0 %v3458_v37 }
 0x200   :  { %2491 = vmatpush1.bf16.msra.mxu0 %v3456_v56 }
 0x201   :  { %2492 = vmatprep.subr.bf16.mxu0 %v3461_v38 }
 0x204   :  { %2493 = vmatpush1.bf16.msra.mxu0 %v3459_v40 }
 0x205   :  { %2494 = vmatprep.subr.bf16.mxu0 %v3464_v41 }
 0x208   :  { %2495 = vmatpush1.bf16.msra.mxu0 %v3462_v42 }
 0x209   :  { %2496 = vmatprep.subr.bf16.mxu0 %v3467_v43 }
 0x20c   :  { %2497 = vmatpush1.bf16.msra.mxu0 %v3465_v44 }
 0x20d   :  { %2498 = vmatprep.subr.bf16.mxu0 %v3470_v45 }
 0x210   :  { %2499 = vmatpush1.bf16.msra.mxu0 %v3468_v46 }
 0x211   :  { %2500 = vmatprep.subr.bf16.mxu0 %v3473_v47 }
 0x214   :  { %2501 = vmatpush1.bf16.msra.mxu0 %v3471_v48 }
 0x215   :  { %2502 = vmatprep.subr.bf16.mxu0 %v3476_v49 }
 0x218   :  { %2503 = vmatpush1.bf16.msra.mxu0 %v3474_v50 }
 0x24f   :  { %v2012_v55 = vpop.f32.mrb[4].mxu1 }
 0x250   :  { %v2952_v57 = vadd.f32 %v2012_v55, %v348_v53  ;;  %v2014_v58 = vpop.f32.mrb[5].mxu1 }
 0x251   :  { %v2953_v59 = vadd.f32 %v2014_v58, %v352_v54  ;;  %v2016_v60 = vpop.f32.mrb[6].mxu1 }
 0x252   :  { %v2954_v1 = vadd.f32 %v2016_v60, %v348_v53  ;;  %v2018_v27 = vpop.f32.mrb[7].mxu1  ;;  %v2023_v3 = vmax.f32 %v2952_v57, 0.0 }
 0x253   :  { %v2955_v2 = vadd.f32 %v2018_v27, %v352_v54  ;;  %v2024_v5 = vmax.f32 %v2953_v59, 0.0 }
 0x254   :  { %v2027_v4 = vmax.f32 %v2954_v1, 0.0 }
 0x255   :  { %v2028_v6 = vmax.f32 %v2955_v2, 0.0 }
 0x256   :  { %v2031_v7 = vpack.c.bf16 %v2027_v4, %v2023_v3 }
 0x257   :  { %v2032_v8 = vpack.c.bf16 %v2028_v6, %v2024_v5 }
 0x259   :  { %2504 = vmatprep.mubr.bf16.mxu0 %v2032_v8  ;;  %v2526_v36 = vpop.permute.xlu0 %2525 }
 0x25a   :  { %2505 = vmatmul.mubr.bf16.vlgmr.msra.gmra.mrb[4].mxu0 %v2031_v7  ;;  %v2531_v61 = vrot.slane %v2526_v36, %v3709_v62 }
 0x32d   :  { %v2506_v28 = vpop.f32.mrb[4].mxu0 }
 0x32e   :  { %v2956_v29 = vadd.f32 %v2506_v28, %v2102_v24  ;;  %v2508_v30 = vpop.f32.mrb[5].mxu0 }
 0x32f   :  { %v2957_v9 = vadd.f32 %v2508_v30, %v2106_v25  ;;  %v2510_v31 = vpop.f32.mrb[6].mxu0 }
 0x330   :  { %v2958_v32 = vadd.f32 %v2510_v31, %v2102_v24  ;;  %v2512_v22 = vpop.f32.mrb[7].mxu0  ;;  %v2515_v17 = vmax.f32 %v2956_v29, 0.0 }
 0x331   :  { %v2959_v23 = vadd.f32 %v2512_v22, %v2106_v25  ;;  %v2516_v34 = vmax.f32 %v2957_v9, 0.0 }
 0x332   :  { %v2517_v33 = vmax.f32 %v2958_v32, 0.0 }
 0x333   :  { %v2518_v26 = vmax.f32 %v2959_v23, 0.0 }
 0x334   :  { %v2519_v10 = vpack.c.bf16 %v2517_v33, %v2515_v17 }
 0x335   :  { %v2520_v35 = vpack.c.bf16 %v2518_v26, %v2516_v34 }
 0x337   :  { %2557 = vmatprep.subr.bf16.mxu1 %v2520_v35 }
 0x338   :  { %2558 = vmatpush1.bf16.xpose.msra.mxu1 %v2519_v10 }
 0x33f   :  { %2590 = vmatmul.mubr.bf16.vlgmr.msra.gmra.mrb[8].mxu1 %v2547_v18 }
 0x412   :  { %v2591_v0 = vpop.f32.mrb[8].mxu1 }
 0x413   :  { %v2592_v39 = vadd.f32 %v2591_v0, %v2531_v61  ;;  %v2593_v37 = vpop.f32.mrb[9].mxu1 }
 0x414   :  { %v2594_v56 = vpop.f32.mrb[10].mxu1 }
 0x415   :  { %v2595_v38 = vpop.f32.mrb[11].mxu1  ;;  %2598 = vst.msk [vmem:[#allocation9] sm:$0x1] %vm2597_vm0, %v2592_v39 }
 0x416   :  { %3554 = shalt.err (!%p3551_p0)
}
 0x417   :  { %s3555_s1 = scalar_lea.hbm %s3756_s7, 16 }
 0x418   :  { %p3556_p1 = scmp.ne.s32.totalorder %s3756_s7, %s3555_s1  ;;  %p3559_p2 = scmp.lt.u32.totalorder %s3555_s1, %s3756_s7 }
 0x41a   :  { %p3561_p3 = pnand %p3559_p2, %p3556_p1 }
 0x41c   :  { %3564 = shalt.err (!%p3561_p3)
}
 0x41d   :  { %2608 = dma.vmem_to_hbm [thread:$0]  %s2606_s5, 16, %s3756_s7, [#allocation5]  }
 0x41e   :  { %3569 = dma.done.wait [#allocation5], 16  }
 0x41f   :  { %3570 = vsyncadd [#allocation5], 4294967280 }
 0x420   :  { %2612 = vsyncpa [#allocation4], 1 }
 0x421   :  { %2613 = vsyncpa [#allocation7], 1 }
 0x422   :  { %2614 = vsyncpa [#allocation5], 1 }

</bundles_post_ra>
